<compile_context>
chip_gen: v7x
topology: tpu7x:2x2x1
jax: 0.10.0
libtpu: 0.0.40
codegen_flags: <defaults>
</compile_context>

<pallas_src>
import functools

import jax
import jax.numpy as jnp
from jax.experimental import pallas as pl
from jax.experimental.pallas import tpu as pltpu


def _round_up(n, m):
    return ((n + m - 1) // m) * m


def _choose_seq_tile(seq_len, target):
    t = max(1, min(target, seq_len))
    while seq_len % t:
        t -= 1
    return t


# ----------------------------------------------------------------------------
# Pallas kernel: one sequence-chunk of the full LSTM chain (all layers, both
# directions), with fc fused into the per-step epilogue.
# ----------------------------------------------------------------------------
def _lstm_chain_kernel(*refs, num_layers, hidden_size, batch, seq_tile,
                       bidirectional, hc, hc_pad):
    H, B, Ts = hidden_size, batch, seq_tile
    ndir = 2 if bidirectional else 1
    DB = ndir * B

    if bidirectional:
        (x_f_ref, x_b_ref, wih0_ref, whh0_ref, b0_ref, wm_ref, bm_ref,
         wfc_ref, bfc_ref,
         out_ref, gates_ref, hn_ref,
         h_state, c_state, proj_ref) = refs
    else:
        (x_f_ref, wih0_ref, whh0_ref, b0_ref, wm_ref, bm_ref,
         wfc_ref, bfc_ref,
         out_ref, gates_ref, hn_ref,
         h_state, c_state, proj_ref) = refs
        x_b_ref = None

    chunk = pl.program_id(0)

    # Zero the carried h/c state on the first time-chunk only.
    @pl.when(chunk == 0)
    def _():
        h_state[...] = jnp.zeros_like(h_state)
        c_state[...] = jnp.zeros_like(c_state)

    # ---- Prologue: layer-0 input projection for the WHOLE chunk, hoisted off
    # the serial recurrence (bias b0 folded in here). ----
    wih0 = wih0_ref[...]
    b0 = b0_ref[...]
    xf = x_f_ref[...].reshape(Ts * B, -1)
    if bidirectional:
        xb = x_b_ref[...].reshape(Ts * B, -1)
        x_all = jnp.concatenate([xf, xb], axis=0)            # (2*Ts*B, In)
    else:
        x_all = xf
    proj = jnp.dot(x_all, wih0, preferred_element_type=jnp.float32) + b0
    proj_ref[...] = proj.reshape(ndir * Ts, B, 4 * H)

    # ---- Loop-invariant values: loaded / broadcast once per chunk. ----
    whh0 = whh0_ref[...]
    if num_layers > 1:
        wm = wm_ref[...]                                     # (2H,4H)=[Wih;Whh]
        bm_b = jnp.broadcast_to(bm_ref[...], (DB, 4 * H))
    wfc = wfc_ref[...]
    bfc_b = jnp.broadcast_to(bfc_ref[...], (B, wfc.shape[1]))

    pad_cols = hc_pad - hc
    pad_zeros = jnp.zeros((B, pad_cols), jnp.float32) if pad_cols else None

    if H % 128 == 0:
        cell_mask = None
    else:
        lane = jax.lax.broadcasted_iota(jnp.int32, (DB, 4 * H), 1)
        cell_mask = (lane >= 2 * H) & (lane < 3 * H)

    def activate(g):
        # gates packed along lanes: [ingate | forgetgate | cellgate | outgate]
        if cell_mask is None:
            # H multiple of 128: slice on vreg boundaries, tanh only cellgate.
            i = jax.nn.sigmoid(g[:, 0 * H:1 * H])
            f = jax.nn.sigmoid(g[:, 1 * H:2 * H])
            gg = jnp.tanh(g[:, 2 * H:3 * H])
            o = jax.nn.sigmoid(g[:, 3 * H:4 * H])
        else:
            # sub-128 H: full-width lane-mask select.
            sig = jax.nn.sigmoid(g)
            th = jnp.tanh(g)
            act = jnp.where(cell_mask, th, sig)
            i, f = act[:, 0 * H:1 * H], act[:, 1 * H:2 * H]
            gg, o = act[:, 2 * H:3 * H], act[:, 3 * H:4 * H]
        return i, f, gg, o

    def split_dirs(v):
        # (2B, H) -> (B, 2H) = [fwd | bwd] lanes; identity if unidirectional.
        if bidirectional:
            return jnp.concatenate([v[:B], v[B:]], axis=-1)
        return v

    hs0 = tuple(h_state[l] for l in range(num_layers))
    cs0 = tuple(c_state[l] for l in range(num_layers))

    def body(j, carry):
        hs, cs = carry
        hs, cs = list(hs), list(cs)

        # Layer 0: only the recurrent matmul sits on the serial chain.
        p = proj_ref[j]
        if bidirectional:
            # backward chain at global step t reads x[S-1-t]; that row lives at
            # local index Ts-1-j of the reversed-index-map block.
            p = jnp.concatenate([p, proj_ref[Ts + (Ts - 1 - j)]], axis=0)
        g0 = p + jnp.dot(hs[0], whh0, preferred_element_type=jnp.float32)
        i, f, gg, o = activate(g0)
        cs[0] = f * cs[0] + i * gg
        hs[0] = o * jnp.tanh(cs[0])
        gates_last = (i, f, gg, o)
        inp = hs[0]           # dropout(p=0.1) between layers -> identity (eval)

        # Layers > 0: SHARED lstm_middle weights, one fused matmul per cell.
        for l in range(1, num_layers):
            xh = jnp.concatenate([inp, hs[l]], axis=-1)      # (DB, 2H)
            g = jnp.dot(xh, wm, preferred_element_type=jnp.float32) + bm_b
            i, f, gg, o = activate(g)
            cs[l] = f * cs[l] + i * gg
            hs[l] = o * jnp.tanh(cs[l])
            gates_last = (i, f, gg, o)
            inp = hs[l]

        # ---- Writeback: lane-dense padded slabs, final layout. ----
        h_cat = split_dirs(hs[-1])                           # (B, Hc)
        c_cat = split_dirs(cs[-1])
        if pad_zeros is not None:
            c_cat = jnp.concatenate([c_cat, pad_zeros], axis=-1)
        hn_ref[j] = c_cat
        for k in range(4):
            row = split_dirs(gates_last[k])
            if pad_zeros is not None:
                row = jnp.concatenate([row, pad_zeros], axis=-1)
            gates_ref[j, k] = row
        # Fused fc: last-layer h never leaves VMEM / touches HBM.
        out_ref[j] = (jnp.dot(h_cat, wfc, preferred_element_type=jnp.float32)
                      + bfc_b)
        return tuple(hs), tuple(cs)

    hs_fin, cs_fin = jax.lax.fori_loop(0, Ts, body, (hs0, cs0),
                                       unroll=min(Ts, 8))

    # Carry h/c to the next time-chunk.
    for l in range(num_layers):
        h_state[l] = hs_fin[l]
        c_state[l] = cs_fin[l]


def lstm_chain(x_sbf, prep, *, num_layers, bidirectional, seq_tile):
    """x_sbf: (S, B, In).  Returns padded, final-layout buffers:
       out   (S, B, OP)      fc output, lanes [:O] valid
       gates (S, 4, B, HcP)  activated [i,f,g,o], lanes [:Hc] valid
       hn    (S, B, HcP)     last-layer cell state, lanes [:Hc] valid."""
    S, B, In = x_sbf.shape
    H = prep["whh0"].shape[0]
    ndir = 2 if bidirectional else 1
    DB = ndir * B
    Hc = ndir * H
    HcP = _round_up(Hc, 128)
    OP = prep["wfc"].shape[1]

    Ts = _choose_seq_tile(S, seq_tile)
    nc = S // Ts

    def _full_spec(a):
        nd = a.ndim
        return pl.BlockSpec(a.shape, lambda c: (0,) * nd)

    in_specs = [pl.BlockSpec((Ts, B, In), lambda c: (c, 0, 0))]
    args = [x_sbf]
    if bidirectional:
        # Same array, REVERSED chunk index map -> no wrapper-side x[::-1] copy.
        in_specs.append(pl.BlockSpec((Ts, B, In), lambda c: (nc - 1 - c, 0, 0)))
        args.append(x_sbf)

    weights = (prep["wih0"], prep["whh0"], prep["b0"],
               prep["wm"], prep["bm"], prep["wfc"], prep["bfc"])
    in_specs.extend(_full_spec(w) for w in weights)
    args.extend(weights)

    out_shape = (jax.ShapeDtypeStruct((S, B, OP), jnp.float32),
                 jax.ShapeDtypeStruct((S, 4, B, HcP), jnp.float32),
                 jax.ShapeDtypeStruct((S, B, HcP), jnp.float32))
    out_specs = (pl.BlockSpec((Ts, B, OP), lambda c: (c, 0, 0)),
                 pl.BlockSpec((Ts, 4, B, HcP), lambda c: (c, 0, 0, 0)),
                 pl.BlockSpec((Ts, B, HcP), lambda c: (c, 0, 0)))

    scratch_shapes = [
        pltpu.VMEM((num_layers, DB, H), jnp.float32),    # carried h
        pltpu.VMEM((num_layers, DB, H), jnp.float32),    # carried c
        pltpu.VMEM((ndir * Ts, B, 4 * H), jnp.float32),  # hoisted layer-0 proj
    ]

    # Explicit VMEM budget: double-buffered blocks + resident weights + scratch.
    itemsize = 4
    block_elems = (ndir * Ts * B * In
                   + Ts * B * OP + Ts * 4 * B * HcP + Ts * B * HcP)
    weight_elems = sum(int(w.size) for w in weights)
    scratch_elems = 2 * num_layers * DB * H + ndir * Ts * B * 4 * H
    vmem_bytes = int(min(
        max(2 * itemsize * (2 * block_elems + weight_elems + scratch_elems),
            32 * 1024 * 1024),
        100 * 1024 * 1024))

    kernel = functools.partial(
        _lstm_chain_kernel, num_layers=num_layers, hidden_size=H, batch=B,
        seq_tile=Ts, bidirectional=bidirectional, hc=Hc, hc_pad=HcP)

    return pl.pallas_call(
        kernel,
        grid=(nc,),
        in_specs=in_specs,
        out_specs=out_specs,
        out_shape=out_shape,
        scratch_shapes=scratch_shapes,
        compiler_params=pltpu.CompilerParams(
            dimension_semantics=("arbitrary",),
            vmem_limit_bytes=vmem_bytes),
    )(*args)


# ----------------------------------------------------------------------------
# One-time parameter preparation (out of the per-forward hot path).
# ----------------------------------------------------------------------------
def prepare_params(params):
    w_ih0, w_hh0, b_ih0, b_hh0 = params["lstm_in"]
    w_ihm, w_hhm, b_ihm, b_hhm = params["lstm_middle"]
    w_fc, b_fc = params["fc_w"], params["fc_b"]
    H = w_hh0.shape[1]
    O, fc_in = w_fc.shape
    OP = _round_up(O, 128)
    wfc_pad = jnp.zeros((fc_in, OP), jnp.float32).at[:, :O].set(
        jnp.transpose(w_fc))
    bfc_pad = jnp.zeros((1, OP), jnp.float32).at[:, :O].set(b_fc)
    return {
        "wih0": jnp.transpose(w_ih0),                          # (In, 4H)
        "whh0": jnp.transpose(w_hh0),                          # (H, 4H)
        "b0": (b_ih0 + b_hh0).reshape(1, 4 * H),
        "wm": jnp.concatenate([jnp.transpose(w_ihm),
                               jnp.transpose(w_hhm)], axis=0), # (2H, 4H)
        "bm": (b_ihm + b_hhm).reshape(1, 4 * H),
        "wfc": wfc_pad,                                        # (fc_in, OP)
        "bfc": bfc_pad,                                        # (1, OP)
    }


# ----------------------------------------------------------------------------
# Model wrapper (mirrors LSTMModel.forward semantics).
# ----------------------------------------------------------------------------
def lstm_model_forward(prep, inputs, *, num_layers, bidirectional, output_size,
                       seq_tile=8):
    """inputs: (B, S, input_size).  Returns:
       outputs       (B, S, output_size)
       gates_stacked (S, 4, B, Hc)   activated [in, forget, cell, out] gates
       hn_stacked    (S, B, Hc)      last-layer cell state per time step."""
    B, S, _ = inputs.shape
    H = prep["whh0"].shape[0]
    Hc = (2 if bidirectional else 1) * H

    x = jnp.transpose(inputs, (1, 0, 2))                       # (S, B, In)
    out_pad, gates_pad, hn_pad = lstm_chain(
        x, prep, num_layers=num_layers, bidirectional=bidirectional,
        seq_tile=seq_tile)

    outputs = jnp.transpose(out_pad[..., :output_size], (1, 0, 2))  # (B,S,O)
    gates_stacked = gates_pad[..., :Hc]                             # (S,4,B,Hc)
    hn_stacked = hn_pad[..., :Hc]                                   # (S,B,Hc)
    return outputs, gates_stacked, hn_stacked


def to_torch_like_outputs(outputs, gates_stacked, hn_stacked):
    """PyTorch-style [outputs, gates (list over S of [i,f,g,o]), hn (list)]."""
    S = gates_stacked.shape[0]
    gates = [[gates_stacked[t, k] for k in range(4)] for t in range(S)]
    hn = [hn_stacked[t] for t in range(S)]
    return [outputs, gates, hn]


# ----------------------------------------------------------------------------
# Pure-JAX transcription of the PyTorch loop (correctness reference).
# ----------------------------------------------------------------------------
def _reference_forward(params, inputs, num_layers, bidirectional):
    w_ih0, w_hh0, b_ih0, b_hh0 = params["lstm_in"]
    w_ihm, w_hhm, b_ihm, b_hhm = params["lstm_middle"]
    w_fc, b_fc = params["fc_w"], params["fc_b"]
    B, S, _ = inputs.shape
    H = w_hh0.shape[1]

    def cell(x, h, c, w_ih, w_hh, bi, bh):
        g = x @ w_ih.T + h @ w_hh.T + bi + bh
        i, f, gg, o = jnp.split(g, 4, axis=1)
        i, f, o = jax.nn.sigmoid(i), jax.nn.sigmoid(f), jax.nn.sigmoid(o)
        gg = jnp.tanh(gg)
        c2 = f * c + i * gg
        h2 = o * jnp.tanh(c2)
        return h2, c2, (i, f, gg, o)

    def run(seq_indices):
        hs = [jnp.zeros((B, H), jnp.float32) for _ in range(num_layers)]
        cs = [jnp.zeros((B, H), jnp.float32) for _ in range(num_layers)]
        outs, gate_list, cn = [], [], []
        for t in seq_indices:
            inp = inputs[:, t, :]
            for l in range(num_layers):
                if l == 0:
                    wi, wh, bi, bh = w_ih0, w_hh0, b_ih0, b_hh0
                else:
                    wi, wh, bi, bh = w_ihm, w_hhm, b_ihm, b_hhm
                hs[l], cs[l], g4 = cell(inp, hs[l], cs[l], wi, wh, bi, bh)
                inp = hs[l]
            outs.append(hs[-1]); gate_list.append(g4); cn.append(cs[-1])
        return outs, gate_list, cn

    o_f, g_f, c_f = run(range(S))
    if bidirectional:
        o_b, g_b, c_b = run(reversed(range(S)))
        o_cat = [jnp.concatenate([a, b], 1) for a, b in zip(o_f, o_b)]
        c_cat = [jnp.concatenate([a, b], 1) for a, b in zip(c_f, c_b)]
        g_cat = [[jnp.concatenate([ga[k], gb[k]], 1) for k in range(4)]
                 for ga, gb in zip(g_f, g_b)]
    else:
        o_cat, c_cat = o_f, c_f
        g_cat = [list(g) for g in g_f]
    outputs = jnp.stack([h @ w_fc.T + b_fc for h in o_cat], axis=1)  # (B,S,O)
    gates_stacked = jnp.stack([jnp.stack(g, 0) for g in g_cat], 0)   # (S,4,B,Hc)
    hn_stacked = jnp.stack(c_cat, 0)                                 # (S,B,Hc)
    return outputs, gates_stacked, hn_stacked


# ----------------------------------------------------------------------------
# Deterministic parameter init (PyTorch RNNCellBase / Linear style: U(-k, k)).
# ----------------------------------------------------------------------------
def init_params(key, input_size, hidden_size, output_size, bidirectional):
    k_cell = 1.0 / jnp.sqrt(hidden_size)
    fc_in = hidden_size * 2 if bidirectional else hidden_size
    k_fc = 1.0 / jnp.sqrt(fc_in)
    keys = jax.random.split(key, 10)

    def u(k, shape, scale):
        return jax.random.uniform(k, shape, jnp.float32, -scale, scale)

    return {
        "lstm_in": (
            u(keys[0], (4 * hidden_size, input_size), k_cell),
            u(keys[1], (4 * hidden_size, hidden_size), k_cell),
            u(keys[2], (4 * hidden_size,), k_cell),
            u(keys[3], (4 * hidden_size,), k_cell),
        ),
        "lstm_middle": (
            u(keys[4], (4 * hidden_size, hidden_size), k_cell),
            u(keys[5], (4 * hidden_size, hidden_size), k_cell),
            u(keys[6], (4 * hidden_size,), k_cell),
            u(keys[7], (4 * hidden_size,), k_cell),
        ),
        "fc_w": u(keys[8], (output_size, fc_in), k_fc),
        "fc_b": u(keys[9], (output_size,), k_fc),
    }


if __name__ == "__main__":
    INPUT_SIZE = 16
    HIDDEN_SIZE = 32
    OUTPUT_SIZE = 8
    NUM_LAYERS = 2
    BIDIRECTIONAL = True
    BATCH = 2
    SEQ = 8
    SEQ_TILE = 4          # 2 time-chunks -> exercises the carried-state grid

    root = jax.random.PRNGKey(0)
    k_params, k_x = jax.random.split(root)
    params = init_params(k_params, INPUT_SIZE, HIDDEN_SIZE, OUTPUT_SIZE,
                         BIDIRECTIONAL)
    x = jax.random.normal(k_x, (BATCH, SEQ, INPUT_SIZE), jnp.float32)

    prep = prepare_params(params)      # one-time: transposes / fuse / padding
    fwd = jax.jit(functools.partial(lstm_model_forward,
                                    num_layers=NUM_LAYERS,
                                    bidirectional=BIDIRECTIONAL,
                                    output_size=OUTPUT_SIZE,
                                    seq_tile=SEQ_TILE))
    outputs, gates_stacked, hn_stacked = fwd(prep, x)
    jax.block_until_ready((outputs, gates_stacked, hn_stacked))

    hc_dim = HIDDEN_SIZE * (2 if BIDIRECTIONAL else 1)
    assert outputs.shape == (BATCH, SEQ, OUTPUT_SIZE)
    assert gates_stacked.shape == (SEQ, 4, BATCH, hc_dim)
    assert hn_stacked.shape == (SEQ, BATCH, hc_dim)

    # Numerics vs. a pure-JAX transcription of the PyTorch reference loop.
    ref_out, ref_gates, ref_hn = _reference_forward(params, x, NUM_LAYERS,
                                                    BIDIRECTIONAL)
    assert jnp.allclose(outputs, ref_out, atol=5e-3, rtol=1e-2)
    assert jnp.allclose(gates_stacked, ref_gates, atol=5e-3, rtol=1e-2)
    assert jnp.allclose(hn_stacked, ref_hn, atol=5e-3, rtol=1e-2)

    # PyTorch-style list-of-lists structure (built outside the hot path).
    _, gates, hn = to_torch_like_outputs(outputs, gates_stacked, hn_stacked)
    assert len(gates) == SEQ and len(gates[0]) == 4
    assert gates[0][0].shape == (BATCH, hc_dim)
    assert len(hn) == SEQ and hn[0].shape == (BATCH, hc_dim)

    print("KERNEL_OK")
</pallas_src>

<mosaic_0001>
module attributes {stable_mosaic.version = 11 : i64} {
  func.func @_lstm_chain_kernel(%arg0: i32, %arg1: memref<4x2x16xf32, #tpu.memory_space<vmem>>, %arg2: memref<4x2x16xf32, #tpu.memory_space<vmem>>, %arg3: memref<16x128xf32, #tpu.memory_space<vmem>>, %arg4: memref<32x128xf32, #tpu.memory_space<vmem>>, %arg5: memref<1x128xf32, #tpu.memory_space<vmem>>, %arg6: memref<64x128xf32, #tpu.memory_space<vmem>>, %arg7: memref<1x128xf32, #tpu.memory_space<vmem>>, %arg8: memref<64x128xf32, #tpu.memory_space<vmem>>, %arg9: memref<1x128xf32, #tpu.memory_space<vmem>>, %arg10: memref<4x2x128xf32, #tpu.memory_space<vmem>>, %arg11: memref<4x4x2x128xf32, #tpu.memory_space<vmem>>, %arg12: memref<4x2x128xf32, #tpu.memory_space<vmem>>, %arg13: memref<2x4x32xf32, #tpu.memory_space<vmem>>, %arg14: memref<2x4x32xf32, #tpu.memory_space<vmem>>, %arg15: memref<8x2x128xf32, #tpu.memory_space<vmem>>) attributes {dimension_semantics = [#tpu.dimension_semantics<arbitrary>], iteration_bounds = array<i64: 2>, scalar_prefetch = 0 : i64, scratch_operands = 3 : i64, tpu.core_type = #tpu.core_type<tc>, window_params = [{transform_indices = @transform_0, window_bounds = array<i64: 4, 2, 16>}, {transform_indices = @transform_1, window_bounds = array<i64: 4, 2, 16>}, {pipeline_mode = #tpu.pipeline_mode<synchronous>, transform_indices = @transform_2, window_bounds = array<i64: 16, 128>}, {pipeline_mode = #tpu.pipeline_mode<synchronous>, transform_indices = @transform_3, window_bounds = array<i64: 32, 128>}, {pipeline_mode = #tpu.pipeline_mode<synchronous>, transform_indices = @transform_4, window_bounds = array<i64: 1, 128>}, {pipeline_mode = #tpu.pipeline_mode<synchronous>, transform_indices = @transform_5, window_bounds = array<i64: 64, 128>}, {pipeline_mode = #tpu.pipeline_mode<synchronous>, transform_indices = @transform_6, window_bounds = array<i64: 1, 128>}, {pipeline_mode = #tpu.pipeline_mode<synchronous>, transform_indices = @transform_7, window_bounds = array<i64: 64, 128>}, {pipeline_mode = #tpu.pipeline_mode<synchronous>, transform_indices = @transform_8, window_bounds = array<i64: 1, 128>}, {transform_indices = @transform_9, window_bounds = array<i64: 4, 2, 128>}, {transform_indices = @transform_10, window_bounds = array<i64: 4, 4, 2, 128>}, {transform_indices = @transform_11, window_bounds = array<i64: 4, 2, 128>}]} {
    %c0_i32 = arith.constant 0 : i32
    %0 = arith.cmpi eq, %arg0, %c0_i32 : i32
    %1 = arith.extui %0 : i1 to i32
    %c0_i32_0 = arith.constant 0 : i32
    %2 = arith.cmpi ne, %1, %c0_i32_0 : i32
    scf.if %2 {
      %cst_154 = arith.constant 0.000000e+00 : f32
      %431 = vector.broadcast %cst_154 : f32 to vector<2x4x32xf32>
      %c0_155 = arith.constant 0 : index
      %c0_156 = arith.constant 0 : index
      %c0_157 = arith.constant 0 : index
      %432 = vector.load %arg13[%c0_155, %c0_156, %c0_157] : memref<2x4x32xf32, #tpu.memory_space<vmem>>, vector<2x4x32xf32>
      tpu.vector_store %arg13[%c0_155, %c0_156, %c0_157], %431 {strides = array<i32>} : memref<2x4x32xf32, #tpu.memory_space<vmem>>, vector<2x4x32xf32>,
      %cst_158 = arith.constant 0.000000e+00 : f32
      %433 = vector.broadcast %cst_158 : f32 to vector<2x4x32xf32>
      %c0_159 = arith.constant 0 : index
      %c0_160 = arith.constant 0 : index
      %c0_161 = arith.constant 0 : index
      %434 = vector.load %arg14[%c0_159, %c0_160, %c0_161] : memref<2x4x32xf32, #tpu.memory_space<vmem>>, vector<2x4x32xf32>
      tpu.vector_store %arg14[%c0_159, %c0_160, %c0_161], %433 {strides = array<i32>} : memref<2x4x32xf32, #tpu.memory_space<vmem>>, vector<2x4x32xf32>,
    } else {
    }
    %c0 = arith.constant 0 : index
    %c0_1 = arith.constant 0 : index
    %3 = vector.load %arg3[%c0, %c0_1] : memref<16x128xf32, #tpu.memory_space<vmem>>, vector<16x128xf32>
    %c0_2 = arith.constant 0 : index
    %c0_3 = arith.constant 0 : index
    %4 = vector.load %arg5[%c0_2, %c0_3] : memref<1x128xf32, #tpu.memory_space<vmem>>, vector<1x128xf32>
    %c0_4 = arith.constant 0 : index
    %c0_5 = arith.constant 0 : index
    %c0_6 = arith.constant 0 : index
    %5 = vector.load %arg1[%c0_4, %c0_5, %c0_6] : memref<4x2x16xf32, #tpu.memory_space<vmem>>, vector<4x2x16xf32>
    %6 = vector.shape_cast %5 : vector<4x2x16xf32> to vector<8x16xf32>
    %c0_7 = arith.constant 0 : index
    %c0_8 = arith.constant 0 : index
    %c0_9 = arith.constant 0 : index
    %7 = vector.load %arg2[%c0_7, %c0_8, %c0_9] : memref<4x2x16xf32, #tpu.memory_space<vmem>>, vector<4x2x16xf32>
    %8 = vector.shape_cast %7 : vector<4x2x16xf32> to vector<8x16xf32>
    %9 = tpu.concatenate %6, %8 in 0 : vector<8x16xf32>, vector<8x16xf32> -> vector<16x16xf32>
    %cst = arith.constant dense<0.000000e+00> : vector<16x128xf32>
    %10 = tpu.matmul %9, %3, %cst {dimension_numbers = #tpu.dot_dimension_numbers<[1], [0], [0], [1], [0, 0, 1, 1], [], []>} : vector<16x16xf32>, vector<16x128xf32>, vector<16x128xf32> -> vector<16x128xf32>
    %11 = vector.broadcast %4 : vector<1x128xf32> to vector<16x128xf32>
    %12 = arith.addf %10, %11 : vector<16x128xf32>
    %13 = vector.shape_cast %12 : vector<16x128xf32> to vector<8x2x128xf32>
    %c0_10 = arith.constant 0 : index
    %c0_11 = arith.constant 0 : index
    %c0_12 = arith.constant 0 : index
    %14 = vector.load %arg15[%c0_10, %c0_11, %c0_12] : memref<8x2x128xf32, #tpu.memory_space<vmem>>, vector<8x2x128xf32>
    tpu.vector_store %arg15[%c0_10, %c0_11, %c0_12], %13 {strides = array<i32>} : memref<8x2x128xf32, #tpu.memory_space<vmem>>, vector<8x2x128xf32>,
    %c0_13 = arith.constant 0 : index
    %c0_14 = arith.constant 0 : index
    %15 = vector.load %arg4[%c0_13, %c0_14] : memref<32x128xf32, #tpu.memory_space<vmem>>, vector<32x128xf32>
    %c0_15 = arith.constant 0 : index
    %c0_16 = arith.constant 0 : index
    %16 = vector.load %arg6[%c0_15, %c0_16] : memref<64x128xf32, #tpu.memory_space<vmem>>, vector<64x128xf32>
    %c0_17 = arith.constant 0 : index
    %c0_18 = arith.constant 0 : index
    %17 = vector.load %arg7[%c0_17, %c0_18] : memref<1x128xf32, #tpu.memory_space<vmem>>, vector<1x128xf32>
    %18 = vector.shape_cast %17 : vector<1x128xf32> to vector<1x128xf32>
    %19 = vector.broadcast %18 : vector<1x128xf32> to vector<4x128xf32>
    %c0_19 = arith.constant 0 : index
    %c0_20 = arith.constant 0 : index
    %20 = vector.load %arg8[%c0_19, %c0_20] : memref<64x128xf32, #tpu.memory_space<vmem>>, vector<64x128xf32>
    %c0_21 = arith.constant 0 : index
    %c0_22 = arith.constant 0 : index
    %21 = vector.load %arg9[%c0_21, %c0_22] : memref<1x128xf32, #tpu.memory_space<vmem>>, vector<1x128xf32>
    %22 = vector.shape_cast %21 : vector<1x128xf32> to vector<1x128xf32>
    %23 = vector.broadcast %22 : vector<1x128xf32> to vector<2x128xf32>
    %cst_23 = arith.constant 0.000000e+00 : f32
    %24 = vector.broadcast %cst_23 : f32 to vector<2x64xf32>
    %25 = tpu.iota {dimensions = array<i32: 1>} : vector<4x128xi32>
    %c64_i32 = arith.constant 64 : i32
    %26 = vector.broadcast %c64_i32 : i32 to vector<4x128xi32>
    %27 = arith.cmpi sge, %25, %26 : vector<4x128xi32>
    %c96_i32 = arith.constant 96 : i32
    %28 = vector.broadcast %c96_i32 : i32 to vector<4x128xi32>
    %29 = arith.cmpi slt, %25, %28 : vector<4x128xi32>
    %30 = arith.andi %27, %29 : vector<4x128xi1>
    %c0_24 = arith.constant 0 : index
    %c0_25 = arith.constant 0 : index
    %c0_26 = arith.constant 0 : index
    %31 = vector.load %arg13[%c0_24, %c0_25, %c0_26] : memref<2x4x32xf32, #tpu.memory_space<vmem>>, vector<1x4x32xf32>
    %32 = vector.shape_cast %31 : vector<1x4x32xf32> to vector<4x32xf32>
    %c1 = arith.constant 1 : index
    %c0_27 = arith.constant 0 : index
    %c0_28 = arith.constant 0 : index
    %33 = vector.load %arg13[%c1, %c0_27, %c0_28] : memref<2x4x32xf32, #tpu.memory_space<vmem>>, vector<1x4x32xf32>
    %34 = vector.shape_cast %33 : vector<1x4x32xf32> to vector<4x32xf32>
    %c0_29 = arith.constant 0 : index
    %c0_30 = arith.constant 0 : index
    %c0_31 = arith.constant 0 : index
    %35 = vector.load %arg14[%c0_29, %c0_30, %c0_31] : memref<2x4x32xf32, #tpu.memory_space<vmem>>, vector<1x4x32xf32>
    %36 = vector.shape_cast %35 : vector<1x4x32xf32> to vector<4x32xf32>
    %c1_32 = arith.constant 1 : index
    %c0_33 = arith.constant 0 : index
    %c0_34 = arith.constant 0 : index
    %37 = vector.load %arg14[%c1_32, %c0_33, %c0_34] : memref<2x4x32xf32, #tpu.memory_space<vmem>>, vector<1x4x32xf32>
    %38 = vector.shape_cast %37 : vector<1x4x32xf32> to vector<4x32xf32>
    %c0_i32_35 = arith.constant 0 : i32
    %39 = arith.index_cast %c0_i32_35 : i32 to index
    %c0_36 = arith.constant 0 : index
    %c0_37 = arith.constant 0 : index
    %40 = vector.load %arg15[%39, %c0_36, %c0_37] : memref<8x2x128xf32, #tpu.memory_space<vmem>>, vector<1x2x128xf32>
    %41 = vector.shape_cast %40 : vector<1x2x128xf32> to vector<2x128xf32>
    %c3_i32 = arith.constant 3 : i32
    %42 = arith.subi %c3_i32, %c0_i32_35 : i32
    %c4_i32 = arith.constant 4 : i32
    %43 = arith.addi %c4_i32, %42 : i32
    %44 = arith.index_cast %43 : i32 to index
    %c0_38 = arith.constant 0 : index
    %c0_39 = arith.constant 0 : index
    %45 = vector.load %arg15[%44, %c0_38, %c0_39] : memref<8x2x128xf32, #tpu.memory_space<vmem>>, vector<1x2x128xf32>
    %46 = vector.shape_cast %45 : vector<1x2x128xf32> to vector<2x128xf32>
    %47 = tpu.concatenate %41, %46 in 0 : vector<2x128xf32>, vector<2x128xf32> -> vector<4x128xf32>
    %cst_40 = arith.constant dense<0.000000e+00> : vector<4x128xf32>
    %48 = tpu.matmul %32, %15, %cst_40 {dimension_numbers = #tpu.dot_dimension_numbers<[1], [0], [0], [1], [0, 0, 1, 1], [], []>} : vector<4x32xf32>, vector<32x128xf32>, vector<4x128xf32> -> vector<4x128xf32>
    %49 = arith.addf %47, %48 : vector<4x128xf32>
    %50 = arith.negf %49 : vector<4x128xf32>
    %51 = math.exp %50 : vector<4x128xf32>
    %cst_41 = arith.constant 1.000000e+00 : f32
    %52 = vector.broadcast %cst_41 : f32 to vector<4x128xf32>
    %53 = arith.addf %52, %51 : vector<4x128xf32>
    %54 = arith.divf %52, %53 : vector<4x128xf32>
    %55 = math.tanh %49 : vector<4x128xf32>
    %56 = arith.select %30, %55, %54 : vector<4x128xi1>, vector<4x128xf32>
    %57 = vector.extract_strided_slice %56 {offsets = [0, 0], sizes = [4, 32], strides = [1, 1]} : vector<4x128xf32> to vector<4x32xf32>
    %58 = vector.extract_strided_slice %56 {offsets = [0, 32], sizes = [4, 32], strides = [1, 1]} : vector<4x128xf32> to vector<4x32xf32>
    %59 = vector.extract_strided_slice %56 {offsets = [0, 64], sizes = [4, 32], strides = [1, 1]} : vector<4x128xf32> to vector<4x32xf32>
    %60 = vector.extract_strided_slice %56 {offsets = [0, 96], sizes = [4, 32], strides = [1, 1]} : vector<4x128xf32> to vector<4x32xf32>
    %61 = arith.mulf %58, %36 : vector<4x32xf32>
    %62 = arith.mulf %57, %59 : vector<4x32xf32>
    %63 = arith.addf %61, %62 : vector<4x32xf32>
    %64 = math.tanh %63 : vector<4x32xf32>
    %65 = arith.mulf %60, %64 : vector<4x32xf32>
    %66 = tpu.concatenate %65, %34 in 1 : vector<4x32xf32>, vector<4x32xf32> -> vector<4x64xf32>
    %cst_42 = arith.constant dense<0.000000e+00> : vector<4x128xf32>
    %67 = tpu.matmul %66, %16, %cst_42 {dimension_numbers = #tpu.dot_dimension_numbers<[1], [0], [0], [1], [0, 0, 1, 1], [], []>} : vector<4x64xf32>, vector<64x128xf32>, vector<4x128xf32> -> vector<4x128xf32>
    %68 = arith.addf %67, %19 : vector<4x128xf32>
    %69 = arith.negf %68 : vector<4x128xf32>
    %70 = math.exp %69 : vector<4x128xf32>
    %cst_43 = arith.constant 1.000000e+00 : f32
    %71 = vector.broadcast %cst_43 : f32 to vector<4x128xf32>
    %72 = arith.addf %71, %70 : vector<4x128xf32>
    %73 = arith.divf %71, %72 : vector<4x128xf32>
    %74 = math.tanh %68 : vector<4x128xf32>
    %75 = arith.select %30, %74, %73 : vector<4x128xi1>, vector<4x128xf32>
    %76 = vector.extract_strided_slice %75 {offsets = [0, 0], sizes = [4, 32], strides = [1, 1]} : vector<4x128xf32> to vector<4x32xf32>
    %77 = vector.extract_strided_slice %75 {offsets = [0, 32], sizes = [4, 32], strides = [1, 1]} : vector<4x128xf32> to vector<4x32xf32>
    %78 = vector.extract_strided_slice %75 {offsets = [0, 64], sizes = [4, 32], strides = [1, 1]} : vector<4x128xf32> to vector<4x32xf32>
    %79 = vector.extract_strided_slice %75 {offsets = [0, 96], sizes = [4, 32], strides = [1, 1]} : vector<4x128xf32> to vector<4x32xf32>
    %80 = arith.mulf %77, %38 : vector<4x32xf32>
    %81 = arith.mulf %76, %78 : vector<4x32xf32>
    %82 = arith.addf %80, %81 : vector<4x32xf32>
    %83 = math.tanh %82 : vector<4x32xf32>
    %84 = arith.mulf %79, %83 : vector<4x32xf32>
    %85 = vector.extract_strided_slice %84 {offsets = [0, 0], sizes = [2, 32], strides = [1, 1]} : vector<4x32xf32> to vector<2x32xf32>
    %86 = vector.extract_strided_slice %84 {offsets = [2, 0], sizes = [2, 32], strides = [1, 1]} : vector<4x32xf32> to vector<2x32xf32>
    %87 = tpu.concatenate %85, %86 in 1 : vector<2x32xf32>, vector<2x32xf32> -> vector<2x64xf32>
    %88 = vector.extract_strided_slice %82 {offsets = [0, 0], sizes = [2, 32], strides = [1, 1]} : vector<4x32xf32> to vector<2x32xf32>
    %89 = vector.extract_strided_slice %82 {offsets = [2, 0], sizes = [2, 32], strides = [1, 1]} : vector<4x32xf32> to vector<2x32xf32>
    %90 = tpu.concatenate %88, %89 in 1 : vector<2x32xf32>, vector<2x32xf32> -> vector<2x64xf32>
    %91 = tpu.concatenate %90, %24 in 1 : vector<2x64xf32>, vector<2x64xf32> -> vector<2x128xf32>
    %92 = arith.index_cast %c0_i32_35 : i32 to index
    %c0_44 = arith.constant 0 : index
    %c0_45 = arith.constant 0 : index
    %93 = vector.load %arg12[%92, %c0_44, %c0_45] : memref<4x2x128xf32, #tpu.memory_space<vmem>>, vector<1x2x128xf32>
    %94 = vector.shape_cast %93 : vector<1x2x128xf32> to vector<2x128xf32>
    %95 = vector.shape_cast %91 : vector<2x128xf32> to vector<1x2x128xf32>
    tpu.vector_store %arg12[%92, %c0_44, %c0_45], %95 {strides = array<i32>} : memref<4x2x128xf32, #tpu.memory_space<vmem>>, vector<1x2x128xf32>,
    %96 = vector.extract_strided_slice %76 {offsets = [0, 0], sizes = [2, 32], strides = [1, 1]} : vector<4x32xf32> to vector<2x32xf32>
    %97 = vector.extract_strided_slice %76 {offsets = [2, 0], sizes = [2, 32], strides = [1, 1]} : vector<4x32xf32> to vector<2x32xf32>
    %98 = tpu.concatenate %96, %97 in 1 : vector<2x32xf32>, vector<2x32xf32> -> vector<2x64xf32>
    %99 = tpu.concatenate %98, %24 in 1 : vector<2x64xf32>, vector<2x64xf32> -> vector<2x128xf32>
    %100 = arith.index_cast %c0_i32_35 : i32 to index
    %c0_46 = arith.constant 0 : index
    %c0_47 = arith.constant 0 : index
    %c0_48 = arith.constant 0 : index
    %101 = vector.load %arg11[%100, %c0_46, %c0_47, %c0_48] : memref<4x4x2x128xf32, #tpu.memory_space<vmem>>, vector<1x1x2x128xf32>
    %102 = vector.shape_cast %101 : vector<1x1x2x128xf32> to vector<2x128xf32>
    %103 = vector.shape_cast %99 : vector<2x128xf32> to vector<1x1x2x128xf32>
    tpu.vector_store %arg11[%100, %c0_46, %c0_47, %c0_48], %103 {strides = array<i32>} : memref<4x4x2x128xf32, #tpu.memory_space<vmem>>, vector<1x1x2x128xf32>,
    %104 = vector.extract_strided_slice %77 {offsets = [0, 0], sizes = [2, 32], strides = [1, 1]} : vector<4x32xf32> to vector<2x32xf32>
    %105 = vector.extract_strided_slice %77 {offsets = [2, 0], sizes = [2, 32], strides = [1, 1]} : vector<4x32xf32> to vector<2x32xf32>
    %106 = tpu.concatenate %104, %105 in 1 : vector<2x32xf32>, vector<2x32xf32> -> vector<2x64xf32>
    %107 = tpu.concatenate %106, %24 in 1 : vector<2x64xf32>, vector<2x64xf32> -> vector<2x128xf32>
    %108 = arith.index_cast %c0_i32_35 : i32 to index
    %c1_49 = arith.constant 1 : index
    %c0_50 = arith.constant 0 : index
    %c0_51 = arith.constant 0 : index
    %109 = vector.load %arg11[%108, %c1_49, %c0_50, %c0_51] : memref<4x4x2x128xf32, #tpu.memory_space<vmem>>, vector<1x1x2x128xf32>
    %110 = vector.shape_cast %109 : vector<1x1x2x128xf32> to vector<2x128xf32>
    %111 = vector.shape_cast %107 : vector<2x128xf32> to vector<1x1x2x128xf32>
    tpu.vector_store %arg11[%108, %c1_49, %c0_50, %c0_51], %111 {strides = array<i32>} : memref<4x4x2x128xf32, #tpu.memory_space<vmem>>, vector<1x1x2x128xf32>,
    %112 = vector.extract_strided_slice %78 {offsets = [0, 0], sizes = [2, 32], strides = [1, 1]} : vector<4x32xf32> to vector<2x32xf32>
    %113 = vector.extract_strided_slice %78 {offsets = [2, 0], sizes = [2, 32], strides = [1, 1]} : vector<4x32xf32> to vector<2x32xf32>
    %114 = tpu.concatenate %112, %113 in 1 : vector<2x32xf32>, vector<2x32xf32> -> vector<2x64xf32>
    %115 = tpu.concatenate %114, %24 in 1 : vector<2x64xf32>, vector<2x64xf32> -> vector<2x128xf32>
    %116 = arith.index_cast %c0_i32_35 : i32 to index
    %c2 = arith.constant 2 : index
    %c0_52 = arith.constant 0 : index
    %c0_53 = arith.constant 0 : index
    %117 = vector.load %arg11[%116, %c2, %c0_52, %c0_53] : memref<4x4x2x128xf32, #tpu.memory_space<vmem>>, vector<1x1x2x128xf32>
    %118 = vector.shape_cast %117 : vector<1x1x2x128xf32> to vector<2x128xf32>
    %119 = vector.shape_cast %115 : vector<2x128xf32> to vector<1x1x2x128xf32>
    tpu.vector_store %arg11[%116, %c2, %c0_52, %c0_53], %119 {strides = array<i32>} : memref<4x4x2x128xf32, #tpu.memory_space<vmem>>, vector<1x1x2x128xf32>,
    %120 = vector.extract_strided_slice %79 {offsets = [0, 0], sizes = [2, 32], strides = [1, 1]} : vector<4x32xf32> to vector<2x32xf32>
    %121 = vector.extract_strided_slice %79 {offsets = [2, 0], sizes = [2, 32], strides = [1, 1]} : vector<4x32xf32> to vector<2x32xf32>
    %122 = tpu.concatenate %120, %121 in 1 : vector<2x32xf32>, vector<2x32xf32> -> vector<2x64xf32>
    %123 = tpu.concatenate %122, %24 in 1 : vector<2x64xf32>, vector<2x64xf32> -> vector<2x128xf32>
    %124 = arith.index_cast %c0_i32_35 : i32 to index
    %c3 = arith.constant 3 : index
    %c0_54 = arith.constant 0 : index
    %c0_55 = arith.constant 0 : index
    %125 = vector.load %arg11[%124, %c3, %c0_54, %c0_55] : memref<4x4x2x128xf32, #tpu.memory_space<vmem>>, vector<1x1x2x128xf32>
    %126 = vector.shape_cast %125 : vector<1x1x2x128xf32> to vector<2x128xf32>
    %127 = vector.shape_cast %123 : vector<2x128xf32> to vector<1x1x2x128xf32>
    tpu.vector_store %arg11[%124, %c3, %c0_54, %c0_55], %127 {strides = array<i32>} : memref<4x4x2x128xf32, #tpu.memory_space<vmem>>, vector<1x1x2x128xf32>,
    %cst_56 = arith.constant dense<0.000000e+00> : vector<2x128xf32>
    %128 = tpu.matmul %87, %20, %cst_56 {dimension_numbers = #tpu.dot_dimension_numbers<[1], [0], [0], [1], [0, 0, 1, 1], [], []>} : vector<2x64xf32>, vector<64x128xf32>, vector<2x128xf32> -> vector<2x128xf32>
    %129 = arith.addf %128, %23 : vector<2x128xf32>
    %130 = arith.index_cast %c0_i32_35 : i32 to index
    %c0_57 = arith.constant 0 : index
    %c0_58 = arith.constant 0 : index
    %131 = vector.load %arg10[%130, %c0_57, %c0_58] : memref<4x2x128xf32, #tpu.memory_space<vmem>>, vector<1x2x128xf32>
    %132 = vector.shape_cast %131 : vector<1x2x128xf32> to vector<2x128xf32>
    %133 = vector.shape_cast %129 : vector<2x128xf32> to vector<1x2x128xf32>
    tpu.vector_store %arg10[%130, %c0_57, %c0_58], %133 {strides = array<i32>} : memref<4x2x128xf32, #tpu.memory_space<vmem>>, vector<1x2x128xf32>,
    %c1_i32 = arith.constant 1 : i32
    %134 = arith.index_cast %c1_i32 : i32 to index
    %c0_59 = arith.constant 0 : index
    %c0_60 = arith.constant 0 : index
    %135 = vector.load %arg15[%134, %c0_59, %c0_60] : memref<8x2x128xf32, #tpu.memory_space<vmem>>, vector<1x2x128xf32>
    %136 = vector.shape_cast %135 : vector<1x2x128xf32> to vector<2x128xf32>
    %c3_i32_61 = arith.constant 3 : i32
    %137 = arith.subi %c3_i32_61, %c1_i32 : i32
    %c4_i32_62 = arith.constant 4 : i32
    %138 = arith.addi %c4_i32_62, %137 : i32
    %139 = arith.index_cast %138 : i32 to index
    %c0_63 = arith.constant 0 : index
    %c0_64 = arith.constant 0 : index
    %140 = vector.load %arg15[%139, %c0_63, %c0_64] : memref<8x2x128xf32, #tpu.memory_space<vmem>>, vector<1x2x128xf32>
    %141 = vector.shape_cast %140 : vector<1x2x128xf32> to vector<2x128xf32>
    %142 = tpu.concatenate %136, %141 in 0 : vector<2x128xf32>, vector<2x128xf32> -> vector<4x128xf32>
    %cst_65 = arith.constant dense<0.000000e+00> : vector<4x128xf32>
    %143 = tpu.matmul %65, %15, %cst_65 {dimension_numbers = #tpu.dot_dimension_numbers<[1], [0], [0], [1], [0, 0, 1, 1], [], []>} : vector<4x32xf32>, vector<32x128xf32>, vector<4x128xf32> -> vector<4x128xf32>
    %144 = arith.addf %142, %143 : vector<4x128xf32>
    %145 = arith.negf %144 : vector<4x128xf32>
    %146 = math.exp %145 : vector<4x128xf32>
    %cst_66 = arith.constant 1.000000e+00 : f32
    %147 = vector.broadcast %cst_66 : f32 to vector<4x128xf32>
    %148 = arith.addf %147, %146 : vector<4x128xf32>
    %149 = arith.divf %147, %148 : vector<4x128xf32>
    %150 = math.tanh %144 : vector<4x128xf32>
    %151 = arith.select %30, %150, %149 : vector<4x128xi1>, vector<4x128xf32>
    %152 = vector.extract_strided_slice %151 {offsets = [0, 0], sizes = [4, 32], strides = [1, 1]} : vector<4x128xf32> to vector<4x32xf32>
    %153 = vector.extract_strided_slice %151 {offsets = [0, 32], sizes = [4, 32], strides = [1, 1]} : vector<4x128xf32> to vector<4x32xf32>
    %154 = vector.extract_strided_slice %151 {offsets = [0, 64], sizes = [4, 32], strides = [1, 1]} : vector<4x128xf32> to vector<4x32xf32>
    %155 = vector.extract_strided_slice %151 {offsets = [0, 96], sizes = [4, 32], strides = [1, 1]} : vector<4x128xf32> to vector<4x32xf32>
    %156 = arith.mulf %153, %63 : vector<4x32xf32>
    %157 = arith.mulf %152, %154 : vector<4x32xf32>
    %158 = arith.addf %156, %157 : vector<4x32xf32>
    %159 = math.tanh %158 : vector<4x32xf32>
    %160 = arith.mulf %155, %159 : vector<4x32xf32>
    %161 = tpu.concatenate %160, %84 in 1 : vector<4x32xf32>, vector<4x32xf32> -> vector<4x64xf32>
    %cst_67 = arith.constant dense<0.000000e+00> : vector<4x128xf32>
    %162 = tpu.matmul %161, %16, %cst_67 {dimension_numbers = #tpu.dot_dimension_numbers<[1], [0], [0], [1], [0, 0, 1, 1], [], []>} : vector<4x64xf32>, vector<64x128xf32>, vector<4x128xf32> -> vector<4x128xf32>
    %163 = arith.addf %162, %19 : vector<4x128xf32>
    %164 = arith.negf %163 : vector<4x128xf32>
    %165 = math.exp %164 : vector<4x128xf32>
    %cst_68 = arith.constant 1.000000e+00 : f32
    %166 = vector.broadcast %cst_68 : f32 to vector<4x128xf32>
    %167 = arith.addf %166, %165 : vector<4x128xf32>
    %168 = arith.divf %166, %167 : vector<4x128xf32>
    %169 = math.tanh %163 : vector<4x128xf32>
    %170 = arith.select %30, %169, %168 : vector<4x128xi1>, vector<4x128xf32>
    %171 = vector.extract_strided_slice %170 {offsets = [0, 0], sizes = [4, 32], strides = [1, 1]} : vector<4x128xf32> to vector<4x32xf32>
    %172 = vector.extract_strided_slice %170 {offsets = [0, 32], sizes = [4, 32], strides = [1, 1]} : vector<4x128xf32> to vector<4x32xf32>
    %173 = vector.extract_strided_slice %170 {offsets = [0, 64], sizes = [4, 32], strides = [1, 1]} : vector<4x128xf32> to vector<4x32xf32>
    %174 = vector.extract_strided_slice %170 {offsets = [0, 96], sizes = [4, 32], strides = [1, 1]} : vector<4x128xf32> to vector<4x32xf32>
    %175 = arith.mulf %172, %82 : vector<4x32xf32>
    %176 = arith.mulf %171, %173 : vector<4x32xf32>
    %177 = arith.addf %175, %176 : vector<4x32xf32>
    %178 = math.tanh %177 : vector<4x32xf32>
    %179 = arith.mulf %174, %178 : vector<4x32xf32>
    %180 = vector.extract_strided_slice %179 {offsets = [0, 0], sizes = [2, 32], strides = [1, 1]} : vector<4x32xf32> to vector<2x32xf32>
    %181 = vector.extract_strided_slice %179 {offsets = [2, 0], sizes = [2, 32], strides = [1, 1]} : vector<4x32xf32> to vector<2x32xf32>
    %182 = tpu.concatenate %180, %181 in 1 : vector<2x32xf32>, vector<2x32xf32> -> vector<2x64xf32>
    %183 = vector.extract_strided_slice %177 {offsets = [0, 0], sizes = [2, 32], strides = [1, 1]} : vector<4x32xf32> to vector<2x32xf32>
    %184 = vector.extract_strided_slice %177 {offsets = [2, 0], sizes = [2, 32], strides = [1, 1]} : vector<4x32xf32> to vector<2x32xf32>
    %185 = tpu.concatenate %183, %184 in 1 : vector<2x32xf32>, vector<2x32xf32> -> vector<2x64xf32>
    %186 = tpu.concatenate %185, %24 in 1 : vector<2x64xf32>, vector<2x64xf32> -> vector<2x128xf32>
    %187 = arith.index_cast %c1_i32 : i32 to index
    %c0_69 = arith.constant 0 : index
    %c0_70 = arith.constant 0 : index
    %188 = vector.load %arg12[%187, %c0_69, %c0_70] : memref<4x2x128xf32, #tpu.memory_space<vmem>>, vector<1x2x128xf32>
    %189 = vector.shape_cast %188 : vector<1x2x128xf32> to vector<2x128xf32>
    %190 = vector.shape_cast %186 : vector<2x128xf32> to vector<1x2x128xf32>
    tpu.vector_store %arg12[%187, %c0_69, %c0_70], %190 {strides = array<i32>} : memref<4x2x128xf32, #tpu.memory_space<vmem>>, vector<1x2x128xf32>,
    %191 = vector.extract_strided_slice %171 {offsets = [0, 0], sizes = [2, 32], strides = [1, 1]} : vector<4x32xf32> to vector<2x32xf32>
    %192 = vector.extract_strided_slice %171 {offsets = [2, 0], sizes = [2, 32], strides = [1, 1]} : vector<4x32xf32> to vector<2x32xf32>
    %193 = tpu.concatenate %191, %192 in 1 : vector<2x32xf32>, vector<2x32xf32> -> vector<2x64xf32>
    %194 = tpu.concatenate %193, %24 in 1 : vector<2x64xf32>, vector<2x64xf32> -> vector<2x128xf32>
    %195 = arith.index_cast %c1_i32 : i32 to index
    %c0_71 = arith.constant 0 : index
    %c0_72 = arith.constant 0 : index
    %c0_73 = arith.constant 0 : index
    %196 = vector.load %arg11[%195, %c0_71, %c0_72, %c0_73] : memref<4x4x2x128xf32, #tpu.memory_space<vmem>>, vector<1x1x2x128xf32>
    %197 = vector.shape_cast %196 : vector<1x1x2x128xf32> to vector<2x128xf32>
    %198 = vector.shape_cast %194 : vector<2x128xf32> to vector<1x1x2x128xf32>
    tpu.vector_store %arg11[%195, %c0_71, %c0_72, %c0_73], %198 {strides = array<i32>} : memref<4x4x2x128xf32, #tpu.memory_space<vmem>>, vector<1x1x2x128xf32>,
    %199 = vector.extract_strided_slice %172 {offsets = [0, 0], sizes = [2, 32], strides = [1, 1]} : vector<4x32xf32> to vector<2x32xf32>
    %200 = vector.extract_strided_slice %172 {offsets = [2, 0], sizes = [2, 32], strides = [1, 1]} : vector<4x32xf32> to vector<2x32xf32>
    %201 = tpu.concatenate %199, %200 in 1 : vector<2x32xf32>, vector<2x32xf32> -> vector<2x64xf32>
    %202 = tpu.concatenate %201, %24 in 1 : vector<2x64xf32>, vector<2x64xf32> -> vector<2x128xf32>
    %203 = arith.index_cast %c1_i32 : i32 to index
    %c1_74 = arith.constant 1 : index
    %c0_75 = arith.constant 0 : index
    %c0_76 = arith.constant 0 : index
    %204 = vector.load %arg11[%203, %c1_74, %c0_75, %c0_76] : memref<4x4x2x128xf32, #tpu.memory_space<vmem>>, vector<1x1x2x128xf32>
    %205 = vector.shape_cast %204 : vector<1x1x2x128xf32> to vector<2x128xf32>
    %206 = vector.shape_cast %202 : vector<2x128xf32> to vector<1x1x2x128xf32>
    tpu.vector_store %arg11[%203, %c1_74, %c0_75, %c0_76], %206 {strides = array<i32>} : memref<4x4x2x128xf32, #tpu.memory_space<vmem>>, vector<1x1x2x128xf32>,
    %207 = vector.extract_strided_slice %173 {offsets = [0, 0], sizes = [2, 32], strides = [1, 1]} : vector<4x32xf32> to vector<2x32xf32>
    %208 = vector.extract_strided_slice %173 {offsets = [2, 0], sizes = [2, 32], strides = [1, 1]} : vector<4x32xf32> to vector<2x32xf32>
    %209 = tpu.concatenate %207, %208 in 1 : vector<2x32xf32>, vector<2x32xf32> -> vector<2x64xf32>
    %210 = tpu.concatenate %209, %24 in 1 : vector<2x64xf32>, vector<2x64xf32> -> vector<2x128xf32>
    %211 = arith.index_cast %c1_i32 : i32 to index
    %c2_77 = arith.constant 2 : index
    %c0_78 = arith.constant 0 : index
    %c0_79 = arith.constant 0 : index
    %212 = vector.load %arg11[%211, %c2_77, %c0_78, %c0_79] : memref<4x4x2x128xf32, #tpu.memory_space<vmem>>, vector<1x1x2x128xf32>
    %213 = vector.shape_cast %212 : vector<1x1x2x128xf32> to vector<2x128xf32>
    %214 = vector.shape_cast %210 : vector<2x128xf32> to vector<1x1x2x128xf32>
    tpu.vector_store %arg11[%211, %c2_77, %c0_78, %c0_79], %214 {strides = array<i32>} : memref<4x4x2x128xf32, #tpu.memory_space<vmem>>, vector<1x1x2x128xf32>,
    %215 = vector.extract_strided_slice %174 {offsets = [0, 0], sizes = [2, 32], strides = [1, 1]} : vector<4x32xf32> to vector<2x32xf32>
    %216 = vector.extract_strided_slice %174 {offsets = [2, 0], sizes = [2, 32], strides = [1, 1]} : vector<4x32xf32> to vector<2x32xf32>
    %217 = tpu.concatenate %215, %216 in 1 : vector<2x32xf32>, vector<2x32xf32> -> vector<2x64xf32>
    %218 = tpu.concatenate %217, %24 in 1 : vector<2x64xf32>, vector<2x64xf32> -> vector<2x128xf32>
    %219 = arith.index_cast %c1_i32 : i32 to index
    %c3_80 = arith.constant 3 : index
    %c0_81 = arith.constant 0 : index
    %c0_82 = arith.constant 0 : index
    %220 = vector.load %arg11[%219, %c3_80, %c0_81, %c0_82] : memref<4x4x2x128xf32, #tpu.memory_space<vmem>>, vector<1x1x2x128xf32>
    %221 = vector.shape_cast %220 : vector<1x1x2x128xf32> to vector<2x128xf32>
    %222 = vector.shape_cast %218 : vector<2x128xf32> to vector<1x1x2x128xf32>
    tpu.vector_store %arg11[%219, %c3_80, %c0_81, %c0_82], %222 {strides = array<i32>} : memref<4x4x2x128xf32, #tpu.memory_space<vmem>>, vector<1x1x2x128xf32>,
    %cst_83 = arith.constant dense<0.000000e+00> : vector<2x128xf32>
    %223 = tpu.matmul %182, %20, %cst_83 {dimension_numbers = #tpu.dot_dimension_numbers<[1], [0], [0], [1], [0, 0, 1, 1], [], []>} : vector<2x64xf32>, vector<64x128xf32>, vector<2x128xf32> -> vector<2x128xf32>
    %224 = arith.addf %223, %23 : vector<2x128xf32>
    %225 = arith.index_cast %c1_i32 : i32 to index
    %c0_84 = arith.constant 0 : index
    %c0_85 = arith.constant 0 : index
    %226 = vector.load %arg10[%225, %c0_84, %c0_85] : memref<4x2x128xf32, #tpu.memory_space<vmem>>, vector<1x2x128xf32>
    %227 = vector.shape_cast %226 : vector<1x2x128xf32> to vector<2x128xf32>
    %228 = vector.shape_cast %224 : vector<2x128xf32> to vector<1x2x128xf32>
    tpu.vector_store %arg10[%225, %c0_84, %c0_85], %228 {strides = array<i32>} : memref<4x2x128xf32, #tpu.memory_space<vmem>>, vector<1x2x128xf32>,
    %c2_i32 = arith.constant 2 : i32
    %229 = arith.index_cast %c2_i32 : i32 to index
    %c0_86 = arith.constant 0 : index
    %c0_87 = arith.constant 0 : index
    %230 = vector.load %arg15[%229, %c0_86, %c0_87] : memref<8x2x128xf32, #tpu.memory_space<vmem>>, vector<1x2x128xf32>
    %231 = vector.shape_cast %230 : vector<1x2x128xf32> to vector<2x128xf32>
    %c3_i32_88 = arith.constant 3 : i32
    %232 = arith.subi %c3_i32_88, %c2_i32 : i32
    %c4_i32_89 = arith.constant 4 : i32
    %233 = arith.addi %c4_i32_89, %232 : i32
    %234 = arith.index_cast %233 : i32 to index
    %c0_90 = arith.constant 0 : index
    %c0_91 = arith.constant 0 : index
    %235 = vector.load %arg15[%234, %c0_90, %c0_91] : memref<8x2x128xf32, #tpu.memory_space<vmem>>, vector<1x2x128xf32>
    %236 = vector.shape_cast %235 : vector<1x2x128xf32> to vector<2x128xf32>
    %237 = tpu.concatenate %231, %236 in 0 : vector<2x128xf32>, vector<2x128xf32> -> vector<4x128xf32>
    %cst_92 = arith.constant dense<0.000000e+00> : vector<4x128xf32>
    %238 = tpu.matmul %160, %15, %cst_92 {dimension_numbers = #tpu.dot_dimension_numbers<[1], [0], [0], [1], [0, 0, 1, 1], [], []>} : vector<4x32xf32>, vector<32x128xf32>, vector<4x128xf32> -> vector<4x128xf32>
    %239 = arith.addf %237, %238 : vector<4x128xf32>
    %240 = arith.negf %239 : vector<4x128xf32>
    %241 = math.exp %240 : vector<4x128xf32>
    %cst_93 = arith.constant 1.000000e+00 : f32
    %242 = vector.broadcast %cst_93 : f32 to vector<4x128xf32>
    %243 = arith.addf %242, %241 : vector<4x128xf32>
    %244 = arith.divf %242, %243 : vector<4x128xf32>
    %245 = math.tanh %239 : vector<4x128xf32>
    %246 = arith.select %30, %245, %244 : vector<4x128xi1>, vector<4x128xf32>
    %247 = vector.extract_strided_slice %246 {offsets = [0, 0], sizes = [4, 32], strides = [1, 1]} : vector<4x128xf32> to vector<4x32xf32>
    %248 = vector.extract_strided_slice %246 {offsets = [0, 32], sizes = [4, 32], strides = [1, 1]} : vector<4x128xf32> to vector<4x32xf32>
    %249 = vector.extract_strided_slice %246 {offsets = [0, 64], sizes = [4, 32], strides = [1, 1]} : vector<4x128xf32> to vector<4x32xf32>
    %250 = vector.extract_strided_slice %246 {offsets = [0, 96], sizes = [4, 32], strides = [1, 1]} : vector<4x128xf32> to vector<4x32xf32>
    %251 = arith.mulf %248, %158 : vector<4x32xf32>
    %252 = arith.mulf %247, %249 : vector<4x32xf32>
    %253 = arith.addf %251, %252 : vector<4x32xf32>
    %254 = math.tanh %253 : vector<4x32xf32>
    %255 = arith.mulf %250, %254 : vector<4x32xf32>
    %256 = tpu.concatenate %255, %179 in 1 : vector<4x32xf32>, vector<4x32xf32> -> vector<4x64xf32>
    %cst_94 = arith.constant dense<0.000000e+00> : vector<4x128xf32>
    %257 = tpu.matmul %256, %16, %cst_94 {dimension_numbers = #tpu.dot_dimension_numbers<[1], [0], [0], [1], [0, 0, 1, 1], [], []>} : vector<4x64xf32>, vector<64x128xf32>, vector<4x128xf32> -> vector<4x128xf32>
    %258 = arith.addf %257, %19 : vector<4x128xf32>
    %259 = arith.negf %258 : vector<4x128xf32>
    %260 = math.exp %259 : vector<4x128xf32>
    %cst_95 = arith.constant 1.000000e+00 : f32
    %261 = vector.broadcast %cst_95 : f32 to vector<4x128xf32>
    %262 = arith.addf %261, %260 : vector<4x128xf32>
    %263 = arith.divf %261, %262 : vector<4x128xf32>
    %264 = math.tanh %258 : vector<4x128xf32>
    %265 = arith.select %30, %264, %263 : vector<4x128xi1>, vector<4x128xf32>
    %266 = vector.extract_strided_slice %265 {offsets = [0, 0], sizes = [4, 32], strides = [1, 1]} : vector<4x128xf32> to vector<4x32xf32>
    %267 = vector.extract_strided_slice %265 {offsets = [0, 32], sizes = [4, 32], strides = [1, 1]} : vector<4x128xf32> to vector<4x32xf32>
    %268 = vector.extract_strided_slice %265 {offsets = [0, 64], sizes = [4, 32], strides = [1, 1]} : vector<4x128xf32> to vector<4x32xf32>
    %269 = vector.extract_strided_slice %265 {offsets = [0, 96], sizes = [4, 32], strides = [1, 1]} : vector<4x128xf32> to vector<4x32xf32>
    %270 = arith.mulf %267, %177 : vector<4x32xf32>
    %271 = arith.mulf %266, %268 : vector<4x32xf32>
    %272 = arith.addf %270, %271 : vector<4x32xf32>
    %273 = math.tanh %272 : vector<4x32xf32>
    %274 = arith.mulf %269, %273 : vector<4x32xf32>
    %275 = vector.extract_strided_slice %274 {offsets = [0, 0], sizes = [2, 32], strides = [1, 1]} : vector<4x32xf32> to vector<2x32xf32>
    %276 = vector.extract_strided_slice %274 {offsets = [2, 0], sizes = [2, 32], strides = [1, 1]} : vector<4x32xf32> to vector<2x32xf32>
    %277 = tpu.concatenate %275, %276 in 1 : vector<2x32xf32>, vector<2x32xf32> -> vector<2x64xf32>
    %278 = vector.extract_strided_slice %272 {offsets = [0, 0], sizes = [2, 32], strides = [1, 1]} : vector<4x32xf32> to vector<2x32xf32>
    %279 = vector.extract_strided_slice %272 {offsets = [2, 0], sizes = [2, 32], strides = [1, 1]} : vector<4x32xf32> to vector<2x32xf32>
    %280 = tpu.concatenate %278, %279 in 1 : vector<2x32xf32>, vector<2x32xf32> -> vector<2x64xf32>
    %281 = tpu.concatenate %280, %24 in 1 : vector<2x64xf32>, vector<2x64xf32> -> vector<2x128xf32>
    %282 = arith.index_cast %c2_i32 : i32 to index
    %c0_96 = arith.constant 0 : index
    %c0_97 = arith.constant 0 : index
    %283 = vector.load %arg12[%282, %c0_96, %c0_97] : memref<4x2x128xf32, #tpu.memory_space<vmem>>, vector<1x2x128xf32>
    %284 = vector.shape_cast %283 : vector<1x2x128xf32> to vector<2x128xf32>
    %285 = vector.shape_cast %281 : vector<2x128xf32> to vector<1x2x128xf32>
    tpu.vector_store %arg12[%282, %c0_96, %c0_97], %285 {strides = array<i32>} : memref<4x2x128xf32, #tpu.memory_space<vmem>>, vector<1x2x128xf32>,
    %286 = vector.extract_strided_slice %266 {offsets = [0, 0], sizes = [2, 32], strides = [1, 1]} : vector<4x32xf32> to vector<2x32xf32>
    %287 = vector.extract_strided_slice %266 {offsets = [2, 0], sizes = [2, 32], strides = [1, 1]} : vector<4x32xf32> to vector<2x32xf32>
    %288 = tpu.concatenate %286, %287 in 1 : vector<2x32xf32>, vector<2x32xf32> -> vector<2x64xf32>
    %289 = tpu.concatenate %288, %24 in 1 : vector<2x64xf32>, vector<2x64xf32> -> vector<2x128xf32>
    %290 = arith.index_cast %c2_i32 : i32 to index
    %c0_98 = arith.constant 0 : index
    %c0_99 = arith.constant 0 : index
    %c0_100 = arith.constant 0 : index
    %291 = vector.load %arg11[%290, %c0_98, %c0_99, %c0_100] : memref<4x4x2x128xf32, #tpu.memory_space<vmem>>, vector<1x1x2x128xf32>
    %292 = vector.shape_cast %291 : vector<1x1x2x128xf32> to vector<2x128xf32>
    %293 = vector.shape_cast %289 : vector<2x128xf32> to vector<1x1x2x128xf32>
    tpu.vector_store %arg11[%290, %c0_98, %c0_99, %c0_100], %293 {strides = array<i32>} : memref<4x4x2x128xf32, #tpu.memory_space<vmem>>, vector<1x1x2x128xf32>,
    %294 = vector.extract_strided_slice %267 {offsets = [0, 0], sizes = [2, 32], strides = [1, 1]} : vector<4x32xf32> to vector<2x32xf32>
    %295 = vector.extract_strided_slice %267 {offsets = [2, 0], sizes = [2, 32], strides = [1, 1]} : vector<4x32xf32> to vector<2x32xf32>
    %296 = tpu.concatenate %294, %295 in 1 : vector<2x32xf32>, vector<2x32xf32> -> vector<2x64xf32>
    %297 = tpu.concatenate %296, %24 in 1 : vector<2x64xf32>, vector<2x64xf32> -> vector<2x128xf32>
    %298 = arith.index_cast %c2_i32 : i32 to index
    %c1_101 = arith.constant 1 : index
    %c0_102 = arith.constant 0 : index
    %c0_103 = arith.constant 0 : index
    %299 = vector.load %arg11[%298, %c1_101, %c0_102, %c0_103] : memref<4x4x2x128xf32, #tpu.memory_space<vmem>>, vector<1x1x2x128xf32>
    %300 = vector.shape_cast %299 : vector<1x1x2x128xf32> to vector<2x128xf32>
    %301 = vector.shape_cast %297 : vector<2x128xf32> to vector<1x1x2x128xf32>
    tpu.vector_store %arg11[%298, %c1_101, %c0_102, %c0_103], %301 {strides = array<i32>} : memref<4x4x2x128xf32, #tpu.memory_space<vmem>>, vector<1x1x2x128xf32>,
    %302 = vector.extract_strided_slice %268 {offsets = [0, 0], sizes = [2, 32], strides = [1, 1]} : vector<4x32xf32> to vector<2x32xf32>
    %303 = vector.extract_strided_slice %268 {offsets = [2, 0], sizes = [2, 32], strides = [1, 1]} : vector<4x32xf32> to vector<2x32xf32>
    %304 = tpu.concatenate %302, %303 in 1 : vector<2x32xf32>, vector<2x32xf32> -> vector<2x64xf32>
    %305 = tpu.concatenate %304, %24 in 1 : vector<2x64xf32>, vector<2x64xf32> -> vector<2x128xf32>
    %306 = arith.index_cast %c2_i32 : i32 to index
    %c2_104 = arith.constant 2 : index
    %c0_105 = arith.constant 0 : index
    %c0_106 = arith.constant 0 : index
    %307 = vector.load %arg11[%306, %c2_104, %c0_105, %c0_106] : memref<4x4x2x128xf32, #tpu.memory_space<vmem>>, vector<1x1x2x128xf32>
    %308 = vector.shape_cast %307 : vector<1x1x2x128xf32> to vector<2x128xf32>
    %309 = vector.shape_cast %305 : vector<2x128xf32> to vector<1x1x2x128xf32>
    tpu.vector_store %arg11[%306, %c2_104, %c0_105, %c0_106], %309 {strides = array<i32>} : memref<4x4x2x128xf32, #tpu.memory_space<vmem>>, vector<1x1x2x128xf32>,
    %310 = vector.extract_strided_slice %269 {offsets = [0, 0], sizes = [2, 32], strides = [1, 1]} : vector<4x32xf32> to vector<2x32xf32>
    %311 = vector.extract_strided_slice %269 {offsets = [2, 0], sizes = [2, 32], strides = [1, 1]} : vector<4x32xf32> to vector<2x32xf32>
    %312 = tpu.concatenate %310, %311 in 1 : vector<2x32xf32>, vector<2x32xf32> -> vector<2x64xf32>
    %313 = tpu.concatenate %312, %24 in 1 : vector<2x64xf32>, vector<2x64xf32> -> vector<2x128xf32>
    %314 = arith.index_cast %c2_i32 : i32 to index
    %c3_107 = arith.constant 3 : index
    %c0_108 = arith.constant 0 : index
    %c0_109 = arith.constant 0 : index
    %315 = vector.load %arg11[%314, %c3_107, %c0_108, %c0_109] : memref<4x4x2x128xf32, #tpu.memory_space<vmem>>, vector<1x1x2x128xf32>
    %316 = vector.shape_cast %315 : vector<1x1x2x128xf32> to vector<2x128xf32>
    %317 = vector.shape_cast %313 : vector<2x128xf32> to vector<1x1x2x128xf32>
    tpu.vector_store %arg11[%314, %c3_107, %c0_108, %c0_109], %317 {strides = array<i32>} : memref<4x4x2x128xf32, #tpu.memory_space<vmem>>, vector<1x1x2x128xf32>,
    %cst_110 = arith.constant dense<0.000000e+00> : vector<2x128xf32>
    %318 = tpu.matmul %277, %20, %cst_110 {dimension_numbers = #tpu.dot_dimension_numbers<[1], [0], [0], [1], [0, 0, 1, 1], [], []>} : vector<2x64xf32>, vector<64x128xf32>, vector<2x128xf32> -> vector<2x128xf32>
    %319 = arith.addf %318, %23 : vector<2x128xf32>
    %320 = arith.index_cast %c2_i32 : i32 to index
    %c0_111 = arith.constant 0 : index
    %c0_112 = arith.constant 0 : index
    %321 = vector.load %arg10[%320, %c0_111, %c0_112] : memref<4x2x128xf32, #tpu.memory_space<vmem>>, vector<1x2x128xf32>
    %322 = vector.shape_cast %321 : vector<1x2x128xf32> to vector<2x128xf32>
    %323 = vector.shape_cast %319 : vector<2x128xf32> to vector<1x2x128xf32>
    tpu.vector_store %arg10[%320, %c0_111, %c0_112], %323 {strides = array<i32>} : memref<4x2x128xf32, #tpu.memory_space<vmem>>, vector<1x2x128xf32>,
    %c3_i32_113 = arith.constant 3 : i32
    %324 = arith.index_cast %c3_i32_113 : i32 to index
    %c0_114 = arith.constant 0 : index
    %c0_115 = arith.constant 0 : index
    %325 = vector.load %arg15[%324, %c0_114, %c0_115] : memref<8x2x128xf32, #tpu.memory_space<vmem>>, vector<1x2x128xf32>
    %326 = vector.shape_cast %325 : vector<1x2x128xf32> to vector<2x128xf32>
    %c3_i32_116 = arith.constant 3 : i32
    %327 = arith.subi %c3_i32_116, %c3_i32_113 : i32
    %c4_i32_117 = arith.constant 4 : i32
    %328 = arith.addi %c4_i32_117, %327 : i32
    %329 = arith.index_cast %328 : i32 to index
    %c0_118 = arith.constant 0 : index
    %c0_119 = arith.constant 0 : index
    %330 = vector.load %arg15[%329, %c0_118, %c0_119] : memref<8x2x128xf32, #tpu.memory_space<vmem>>, vector<1x2x128xf32>
    %331 = vector.shape_cast %330 : vector<1x2x128xf32> to vector<2x128xf32>
    %332 = tpu.concatenate %326, %331 in 0 : vector<2x128xf32>, vector<2x128xf32> -> vector<4x128xf32>
    %cst_120 = arith.constant dense<0.000000e+00> : vector<4x128xf32>
    %333 = tpu.matmul %255, %15, %cst_120 {dimension_numbers = #tpu.dot_dimension_numbers<[1], [0], [0], [1], [0, 0, 1, 1], [], []>} : vector<4x32xf32>, vector<32x128xf32>, vector<4x128xf32> -> vector<4x128xf32>
    %334 = arith.addf %332, %333 : vector<4x128xf32>
    %335 = arith.negf %334 : vector<4x128xf32>
    %336 = math.exp %335 : vector<4x128xf32>
    %cst_121 = arith.constant 1.000000e+00 : f32
    %337 = vector.broadcast %cst_121 : f32 to vector<4x128xf32>
    %338 = arith.addf %337, %336 : vector<4x128xf32>
    %339 = arith.divf %337, %338 : vector<4x128xf32>
    %340 = math.tanh %334 : vector<4x128xf32>
    %341 = arith.select %30, %340, %339 : vector<4x128xi1>, vector<4x128xf32>
    %342 = vector.extract_strided_slice %341 {offsets = [0, 0], sizes = [4, 32], strides = [1, 1]} : vector<4x128xf32> to vector<4x32xf32>
    %343 = vector.extract_strided_slice %341 {offsets = [0, 32], sizes = [4, 32], strides = [1, 1]} : vector<4x128xf32> to vector<4x32xf32>
    %344 = vector.extract_strided_slice %341 {offsets = [0, 64], sizes = [4, 32], strides = [1, 1]} : vector<4x128xf32> to vector<4x32xf32>
    %345 = vector.extract_strided_slice %341 {offsets = [0, 96], sizes = [4, 32], strides = [1, 1]} : vector<4x128xf32> to vector<4x32xf32>
    %346 = arith.mulf %343, %253 : vector<4x32xf32>
    %347 = arith.mulf %342, %344 : vector<4x32xf32>
    %348 = arith.addf %346, %347 : vector<4x32xf32>
    %349 = math.tanh %348 : vector<4x32xf32>
    %350 = arith.mulf %345, %349 : vector<4x32xf32>
    %351 = tpu.concatenate %350, %274 in 1 : vector<4x32xf32>, vector<4x32xf32> -> vector<4x64xf32>
    %cst_122 = arith.constant dense<0.000000e+00> : vector<4x128xf32>
    %352 = tpu.matmul %351, %16, %cst_122 {dimension_numbers = #tpu.dot_dimension_numbers<[1], [0], [0], [1], [0, 0, 1, 1], [], []>} : vector<4x64xf32>, vector<64x128xf32>, vector<4x128xf32> -> vector<4x128xf32>
    %353 = arith.addf %352, %19 : vector<4x128xf32>
    %354 = arith.negf %353 : vector<4x128xf32>
    %355 = math.exp %354 : vector<4x128xf32>
    %cst_123 = arith.constant 1.000000e+00 : f32
    %356 = vector.broadcast %cst_123 : f32 to vector<4x128xf32>
    %357 = arith.addf %356, %355 : vector<4x128xf32>
    %358 = arith.divf %356, %357 : vector<4x128xf32>
    %359 = math.tanh %353 : vector<4x128xf32>
    %360 = arith.select %30, %359, %358 : vector<4x128xi1>, vector<4x128xf32>
    %361 = vector.extract_strided_slice %360 {offsets = [0, 0], sizes = [4, 32], strides = [1, 1]} : vector<4x128xf32> to vector<4x32xf32>
    %362 = vector.extract_strided_slice %360 {offsets = [0, 32], sizes = [4, 32], strides = [1, 1]} : vector<4x128xf32> to vector<4x32xf32>
    %363 = vector.extract_strided_slice %360 {offsets = [0, 64], sizes = [4, 32], strides = [1, 1]} : vector<4x128xf32> to vector<4x32xf32>
    %364 = vector.extract_strided_slice %360 {offsets = [0, 96], sizes = [4, 32], strides = [1, 1]} : vector<4x128xf32> to vector<4x32xf32>
    %365 = arith.mulf %362, %272 : vector<4x32xf32>
    %366 = arith.mulf %361, %363 : vector<4x32xf32>
    %367 = arith.addf %365, %366 : vector<4x32xf32>
    %368 = math.tanh %367 : vector<4x32xf32>
    %369 = arith.mulf %364, %368 : vector<4x32xf32>
    %370 = vector.extract_strided_slice %369 {offsets = [0, 0], sizes = [2, 32], strides = [1, 1]} : vector<4x32xf32> to vector<2x32xf32>
    %371 = vector.extract_strided_slice %369 {offsets = [2, 0], sizes = [2, 32], strides = [1, 1]} : vector<4x32xf32> to vector<2x32xf32>
    %372 = tpu.concatenate %370, %371 in 1 : vector<2x32xf32>, vector<2x32xf32> -> vector<2x64xf32>
    %373 = vector.extract_strided_slice %367 {offsets = [0, 0], sizes = [2, 32], strides = [1, 1]} : vector<4x32xf32> to vector<2x32xf32>
    %374 = vector.extract_strided_slice %367 {offsets = [2, 0], sizes = [2, 32], strides = [1, 1]} : vector<4x32xf32> to vector<2x32xf32>
    %375 = tpu.concatenate %373, %374 in 1 : vector<2x32xf32>, vector<2x32xf32> -> vector<2x64xf32>
    %376 = tpu.concatenate %375, %24 in 1 : vector<2x64xf32>, vector<2x64xf32> -> vector<2x128xf32>
    %377 = arith.index_cast %c3_i32_113 : i32 to index
    %c0_124 = arith.constant 0 : index
    %c0_125 = arith.constant 0 : index
    %378 = vector.load %arg12[%377, %c0_124, %c0_125] : memref<4x2x128xf32, #tpu.memory_space<vmem>>, vector<1x2x128xf32>
    %379 = vector.shape_cast %378 : vector<1x2x128xf32> to vector<2x128xf32>
    %380 = vector.shape_cast %376 : vector<2x128xf32> to vector<1x2x128xf32>
    tpu.vector_store %arg12[%377, %c0_124, %c0_125], %380 {strides = array<i32>} : memref<4x2x128xf32, #tpu.memory_space<vmem>>, vector<1x2x128xf32>,
    %381 = vector.extract_strided_slice %361 {offsets = [0, 0], sizes = [2, 32], strides = [1, 1]} : vector<4x32xf32> to vector<2x32xf32>
    %382 = vector.extract_strided_slice %361 {offsets = [2, 0], sizes = [2, 32], strides = [1, 1]} : vector<4x32xf32> to vector<2x32xf32>
    %383 = tpu.concatenate %381, %382 in 1 : vector<2x32xf32>, vector<2x32xf32> -> vector<2x64xf32>
    %384 = tpu.concatenate %383, %24 in 1 : vector<2x64xf32>, vector<2x64xf32> -> vector<2x128xf32>
    %385 = arith.index_cast %c3_i32_113 : i32 to index
    %c0_126 = arith.constant 0 : index
    %c0_127 = arith.constant 0 : index
    %c0_128 = arith.constant 0 : index
    %386 = vector.load %arg11[%385, %c0_126, %c0_127, %c0_128] : memref<4x4x2x128xf32, #tpu.memory_space<vmem>>, vector<1x1x2x128xf32>
    %387 = vector.shape_cast %386 : vector<1x1x2x128xf32> to vector<2x128xf32>
    %388 = vector.shape_cast %384 : vector<2x128xf32> to vector<1x1x2x128xf32>
    tpu.vector_store %arg11[%385, %c0_126, %c0_127, %c0_128], %388 {strides = array<i32>} : memref<4x4x2x128xf32, #tpu.memory_space<vmem>>, vector<1x1x2x128xf32>,
    %389 = vector.extract_strided_slice %362 {offsets = [0, 0], sizes = [2, 32], strides = [1, 1]} : vector<4x32xf32> to vector<2x32xf32>
    %390 = vector.extract_strided_slice %362 {offsets = [2, 0], sizes = [2, 32], strides = [1, 1]} : vector<4x32xf32> to vector<2x32xf32>
    %391 = tpu.concatenate %389, %390 in 1 : vector<2x32xf32>, vector<2x32xf32> -> vector<2x64xf32>
    %392 = tpu.concatenate %391, %24 in 1 : vector<2x64xf32>, vector<2x64xf32> -> vector<2x128xf32>
    %393 = arith.index_cast %c3_i32_113 : i32 to index
    %c1_129 = arith.constant 1 : index
    %c0_130 = arith.constant 0 : index
    %c0_131 = arith.constant 0 : index
    %394 = vector.load %arg11[%393, %c1_129, %c0_130, %c0_131] : memref<4x4x2x128xf32, #tpu.memory_space<vmem>>, vector<1x1x2x128xf32>
    %395 = vector.shape_cast %394 : vector<1x1x2x128xf32> to vector<2x128xf32>
    %396 = vector.shape_cast %392 : vector<2x128xf32> to vector<1x1x2x128xf32>
    tpu.vector_store %arg11[%393, %c1_129, %c0_130, %c0_131], %396 {strides = array<i32>} : memref<4x4x2x128xf32, #tpu.memory_space<vmem>>, vector<1x1x2x128xf32>,
    %397 = vector.extract_strided_slice %363 {offsets = [0, 0], sizes = [2, 32], strides = [1, 1]} : vector<4x32xf32> to vector<2x32xf32>
    %398 = vector.extract_strided_slice %363 {offsets = [2, 0], sizes = [2, 32], strides = [1, 1]} : vector<4x32xf32> to vector<2x32xf32>
    %399 = tpu.concatenate %397, %398 in 1 : vector<2x32xf32>, vector<2x32xf32> -> vector<2x64xf32>
    %400 = tpu.concatenate %399, %24 in 1 : vector<2x64xf32>, vector<2x64xf32> -> vector<2x128xf32>
    %401 = arith.index_cast %c3_i32_113 : i32 to index
    %c2_132 = arith.constant 2 : index
    %c0_133 = arith.constant 0 : index
    %c0_134 = arith.constant 0 : index
    %402 = vector.load %arg11[%401, %c2_132, %c0_133, %c0_134] : memref<4x4x2x128xf32, #tpu.memory_space<vmem>>, vector<1x1x2x128xf32>
    %403 = vector.shape_cast %402 : vector<1x1x2x128xf32> to vector<2x128xf32>
    %404 = vector.shape_cast %400 : vector<2x128xf32> to vector<1x1x2x128xf32>
    tpu.vector_store %arg11[%401, %c2_132, %c0_133, %c0_134], %404 {strides = array<i32>} : memref<4x4x2x128xf32, #tpu.memory_space<vmem>>, vector<1x1x2x128xf32>,
    %405 = vector.extract_strided_slice %364 {offsets = [0, 0], sizes = [2, 32], strides = [1, 1]} : vector<4x32xf32> to vector<2x32xf32>
    %406 = vector.extract_strided_slice %364 {offsets = [2, 0], sizes = [2, 32], strides = [1, 1]} : vector<4x32xf32> to vector<2x32xf32>
    %407 = tpu.concatenate %405, %406 in 1 : vector<2x32xf32>, vector<2x32xf32> -> vector<2x64xf32>
    %408 = tpu.concatenate %407, %24 in 1 : vector<2x64xf32>, vector<2x64xf32> -> vector<2x128xf32>
    %409 = arith.index_cast %c3_i32_113 : i32 to index
    %c3_135 = arith.constant 3 : index
    %c0_136 = arith.constant 0 : index
    %c0_137 = arith.constant 0 : index
    %410 = vector.load %arg11[%409, %c3_135, %c0_136, %c0_137] : memref<4x4x2x128xf32, #tpu.memory_space<vmem>>, vector<1x1x2x128xf32>
    %411 = vector.shape_cast %410 : vector<1x1x2x128xf32> to vector<2x128xf32>
    %412 = vector.shape_cast %408 : vector<2x128xf32> to vector<1x1x2x128xf32>
    tpu.vector_store %arg11[%409, %c3_135, %c0_136, %c0_137], %412 {strides = array<i32>} : memref<4x4x2x128xf32, #tpu.memory_space<vmem>>, vector<1x1x2x128xf32>,
    %cst_138 = arith.constant dense<0.000000e+00> : vector<2x128xf32>
    %413 = tpu.matmul %372, %20, %cst_138 {dimension_numbers = #tpu.dot_dimension_numbers<[1], [0], [0], [1], [0, 0, 1, 1], [], []>} : vector<2x64xf32>, vector<64x128xf32>, vector<2x128xf32> -> vector<2x128xf32>
    %414 = arith.addf %413, %23 : vector<2x128xf32>
    %415 = arith.index_cast %c3_i32_113 : i32 to index
    %c0_139 = arith.constant 0 : index
    %c0_140 = arith.constant 0 : index
    %416 = vector.load %arg10[%415, %c0_139, %c0_140] : memref<4x2x128xf32, #tpu.memory_space<vmem>>, vector<1x2x128xf32>
    %417 = vector.shape_cast %416 : vector<1x2x128xf32> to vector<2x128xf32>
    %418 = vector.shape_cast %414 : vector<2x128xf32> to vector<1x2x128xf32>
    tpu.vector_store %arg10[%415, %c0_139, %c0_140], %418 {strides = array<i32>} : memref<4x2x128xf32, #tpu.memory_space<vmem>>, vector<1x2x128xf32>,
    %c4_i32_141 = arith.constant 4 : i32
    %c0_142 = arith.constant 0 : index
    %c0_143 = arith.constant 0 : index
    %c0_144 = arith.constant 0 : index
    %419 = vector.load %arg13[%c0_142, %c0_143, %c0_144] : memref<2x4x32xf32, #tpu.memory_space<vmem>>, vector<1x4x32xf32>
    %420 = vector.shape_cast %419 : vector<1x4x32xf32> to vector<4x32xf32>
    %421 = vector.shape_cast %350 : vector<4x32xf32> to vector<1x4x32xf32>
    tpu.vector_store %arg13[%c0_142, %c0_143, %c0_144], %421 {strides = array<i32>} : memref<2x4x32xf32, #tpu.memory_space<vmem>>, vector<1x4x32xf32>,
    %c0_145 = arith.constant 0 : index
    %c0_146 = arith.constant 0 : index
    %c0_147 = arith.constant 0 : index
    %422 = vector.load %arg14[%c0_145, %c0_146, %c0_147] : memref<2x4x32xf32, #tpu.memory_space<vmem>>, vector<1x4x32xf32>
    %423 = vector.shape_cast %422 : vector<1x4x32xf32> to vector<4x32xf32>
    %424 = vector.shape_cast %348 : vector<4x32xf32> to vector<1x4x32xf32>
    tpu.vector_store %arg14[%c0_145, %c0_146, %c0_147], %424 {strides = array<i32>} : memref<2x4x32xf32, #tpu.memory_space<vmem>>, vector<1x4x32xf32>,
    %c1_148 = arith.constant 1 : index
    %c0_149 = arith.constant 0 : index
    %c0_150 = arith.constant 0 : index
    %425 = vector.load %arg13[%c1_148, %c0_149, %c0_150] : memref<2x4x32xf32, #tpu.memory_space<vmem>>, vector<1x4x32xf32>
    %426 = vector.shape_cast %425 : vector<1x4x32xf32> to vector<4x32xf32>
    %427 = vector.shape_cast %369 : vector<4x32xf32> to vector<1x4x32xf32>
    tpu.vector_store %arg13[%c1_148, %c0_149, %c0_150], %427 {strides = array<i32>} : memref<2x4x32xf32, #tpu.memory_space<vmem>>, vector<1x4x32xf32>,
    %c1_151 = arith.constant 1 : index
    %c0_152 = arith.constant 0 : index
    %c0_153 = arith.constant 0 : index
    %428 = vector.load %arg14[%c1_151, %c0_152, %c0_153] : memref<2x4x32xf32, #tpu.memory_space<vmem>>, vector<1x4x32xf32>
    %429 = vector.shape_cast %428 : vector<1x4x32xf32> to vector<4x32xf32>
    %430 = vector.shape_cast %367 : vector<4x32xf32> to vector<1x4x32xf32>
    tpu.vector_store %arg14[%c1_151, %c0_152, %c0_153], %430 {strides = array<i32>} : memref<2x4x32xf32, #tpu.memory_space<vmem>>, vector<1x4x32xf32>,
    return
  }
  func.func @transform_0(%arg0: i32) -> (i32, i32, i32) {
    %c0_i32 = arith.constant 0 : i32
    %c0_i32_0 = arith.constant 0 : i32
    %c0_i32_1 = arith.constant 0 : i32
    return %arg0, %c0_i32, %c0_i32_0 : i32, i32, i32
  }
  func.func @transform_1(%arg0: i32) -> (i32, i32, i32) {
    %c1_i32 = arith.constant 1 : i32
    %0 = arith.subi %c1_i32, %arg0 : i32
    %c0_i32 = arith.constant 0 : i32
    %c0_i32_0 = arith.constant 0 : i32
    %c0_i32_1 = arith.constant 0 : i32
    return %0, %c0_i32, %c0_i32_0 : i32, i32, i32
  }
  func.func @transform_2(%arg0: i32) -> (i32, i32) {
    %c0_i32 = arith.constant 0 : i32
    %c0_i32_0 = arith.constant 0 : i32
    %c0_i32_1 = arith.constant 0 : i32
    return %c0_i32, %c0_i32_0 : i32, i32
  }
  func.func @transform_3(%arg0: i32) -> (i32, i32) {
    %c0_i32 = arith.constant 0 : i32
    %c0_i32_0 = arith.constant 0 : i32
    %c0_i32_1 = arith.constant 0 : i32
    return %c0_i32, %c0_i32_0 : i32, i32
  }
  func.func @transform_4(%arg0: i32) -> (i32, i32) {
    %c0_i32 = arith.constant 0 : i32
    %c0_i32_0 = arith.constant 0 : i32
    %c0_i32_1 = arith.constant 0 : i32
    return %c0_i32, %c0_i32_0 : i32, i32
  }
  func.func @transform_5(%arg0: i32) -> (i32, i32) {
    %c0_i32 = arith.constant 0 : i32
    %c0_i32_0 = arith.constant 0 : i32
    %c0_i32_1 = arith.constant 0 : i32
    return %c0_i32, %c0_i32_0 : i32, i32
  }
  func.func @transform_6(%arg0: i32) -> (i32, i32) {
    %c0_i32 = arith.constant 0 : i32
    %c0_i32_0 = arith.constant 0 : i32
    %c0_i32_1 = arith.constant 0 : i32
    return %c0_i32, %c0_i32_0 : i32, i32
  }
  func.func @transform_7(%arg0: i32) -> (i32, i32) {
    %c0_i32 = arith.constant 0 : i32
    %c0_i32_0 = arith.constant 0 : i32
    %c0_i32_1 = arith.constant 0 : i32
    return %c0_i32, %c0_i32_0 : i32, i32
  }
  func.func @transform_8(%arg0: i32) -> (i32, i32) {
    %c0_i32 = arith.constant 0 : i32
    %c0_i32_0 = arith.constant 0 : i32
    %c0_i32_1 = arith.constant 0 : i32
    return %c0_i32, %c0_i32_0 : i32, i32
  }
  func.func @transform_9(%arg0: i32) -> (i32, i32, i32) {
    %c0_i32 = arith.constant 0 : i32
    %c0_i32_0 = arith.constant 0 : i32
    %c0_i32_1 = arith.constant 0 : i32
    return %arg0, %c0_i32, %c0_i32_0 : i32, i32, i32
  }
  func.func @transform_10(%arg0: i32) -> (i32, i32, i32, i32) {
    %c0_i32 = arith.constant 0 : i32
    %c0_i32_0 = arith.constant 0 : i32
    %c0_i32_1 = arith.constant 0 : i32
    %c0_i32_2 = arith.constant 0 : i32
    return %arg0, %c0_i32, %c0_i32_0, %c0_i32_1 : i32, i32, i32, i32
  }
  func.func @transform_11(%arg0: i32) -> (i32, i32, i32) {
    %c0_i32 = arith.constant 0 : i32
    %c0_i32_0 = arith.constant 0 : i32
    %c0_i32_1 = arith.constant 0 : i32
    return %arg0, %c0_i32, %c0_i32_0 : i32, i32, i32
  }
}

</mosaic_0001>

<bundles_post_ra>
// kernel: lstm_model_forward.1
= control target key start
LH: loop header
LB: loop body
LE: loop exit
PB: predicated region body
PF: predicated region fallthrough
CT: control target
= control target key end

     0   :  { %s3933_s0 = inlined_call_operand.vmem [shape: f32[8,2,16], index: 0, kind: input, shape index: {}, may-alias: {0,1}]   ;;  %s3934_s1 = inlined_call_operand.vmem [shape: f32[8,2,16], index: 1, kind: input, shape index: {}, may-alias: {0,1}]   ;;  %s3935_s2 = inlined_call_operand.hbm [shape: f32[16,128], index: 2, kind: input, shape index: {}]   ;;  %s3936_s3 = inlined_call_operand.vmem [shape: f32[32,128], index: 3, kind: input, shape index: {}]   ;;  %s3937_s4 = inlined_call_operand.vmem [shape: f32[1,128], index: 4, kind: input, shape index: {}]   ;;  %s3938_s5 = inlined_call_operand.hbm [shape: f32[64,128], index: 5, kind: input, shape index: {}]   ;;  %s3939_s6 = inlined_call_operand.vmem [shape: f32[1,128], index: 6, kind: input, shape index: {}]   ;;  %s3940_s7 = inlined_call_operand.hbm [shape: f32[64,128], index: 7, kind: input, shape index: {}]   ;;  %s3941_s8 = inlined_call_operand.vmem [shape: f32[1,128], index: 8, kind: input, shape index: {}]   ;;  %s3942_s9 = inlined_call_operand.vmem [shape: f32[8,2,128], index: 9, kind: output, shape index: {0}]   ;;  %s3943_s10 = inlined_call_operand.hbm [shape: f32[8,4,2,128], index: 10, kind: output, shape index: {1}]   ;;  %s3944_s11 = inlined_call_operand.hbm [shape: f32[8,2,128], index: 11, kind: output, shape index: {2}]  }
   0x1   :  { %3955 = sst [smem:[#allocation24_spill]] %s3935_s2 }
   0x2   :  { %3956 = sst [smem:[#allocation25_spill]] %s3944_s11 }
   0x3   :  { %17 = vsyncpa [#allocation6], 0 }
   0x4   :  { %18 = vsyncpa [#allocation9], 0 }
   0x5   :  { %19 = vsyncpa [#allocation7], 0 }
   0x6   :  { %21 = vsyncpa [#allocation7 + $0x1], 0 }
   0x7   :  { %22 = vsyncpa [#allocation13], 0 }
   0x8   :  { %24 = vsyncpa [#allocation13 + $0x1], 0  ;;  %s3230_s17 = smov 0   ;;  %s3232_s18 = smov 0  }
   0x9   :  { %s3234_s19 = smov 0   ;;  %s3236_s20 = smov 0  }
   0xa LB: > { %3957 = sst [smem:[#allocation18_spill]] %s3140_s17  ;;  %s3251_s21 = sadd.s32 4294967295, %s3152_s20   ;;  %s3152_s20 = sphi %s3236_s20, %s3983_s20   ;;  %s3148_s19 = sphi %s3234_s19, %s3985_s19   ;;  %s3144_s18 = sphi %s3232_s18, %s3987_s18   ;;  %s3140_s17 = sphi %s3230_s17, %s3986_s17  }
   0xb   : > { %3958 = sst [smem:[#allocation19_spill]] %s3148_s19  ;;  %s2312_s22 = sadd.s32 4294967294, %s3152_s20  }
   0xc   : > { %3959 = sst [smem:[#allocation20_spill]] %s3152_s20  ;;  %s3255_s23 = sadd.s32 1, %s3152_s20  }
   0xd   : > { %3960 = sst [smem:[#allocation21_spill]] %s3255_s23  ;;  %s264_s24 = sadd.s32 1, %s3148_s19 }
   0xe   : > { %s261_s25 = ssub.s32 %s3152_s20, %s3255_s23  ;;  %p274_p0 = scmp.ne.s32.totalorder %s3148_s19, %s3144_s18 }
   0xf   : > { %p262_p1 = scmp.eq.s32.totalorder %s261_s25, 0  ;;  %p275_p2 = scmp.eq.s32.totalorder %s3251_s21, 1 }
  0x10   : > { %p280_p3 = scmp.ne.s32.totalorder %s3144_s18, %s3140_s17  ;;  %p281_p4 = scmp.eq.s32.totalorder %s2312_s22, 1 }
  0x11   : > { %s3266_s26 = scalar_select %p262_p1, %s3148_s19, %s264_s24  }
  0x12   : > { %p3268_p5 = por %p275_p2, %p274_p0  ;;  %p3272_p6 = por %p281_p4, %p280_p3 }
  0x13   : > { %3961 = sst [smem:[#allocation22_spill]] %s3266_s26  ;;  %p2313_p7 = scmp.ge.s32.totalorder %s3152_s20, 1 }
  0x14   : > { %s3962_s27 = scalar_select %p3268_p5, 1, 0 }
  0x15   : > { %s3963_s28 = scalar_select %p3272_p6, 1, 0 }
  0x16   : > { %p314_p8 = scmp.lt.s32.totalorder %s3152_s20, 3  ;;  %p3948_p10 = scmp.eq.s32.totalorder %s3251_s21, 0 }
  0x17   : > { %3964 = sst [smem:[#allocation23_spill]] %s3963_s28  ;;  %s3154_s30 = smov [#allocation8]  }
  0x18   : > { %p3280_p11 = pnand %p2313_p7, %p314_p8  ;;  %s345_s12 = sshll.u32 %s3154_s30, 4  ;;  %s3286_s12 = int_to_ptr.vmem [resolvable:$true] %s345_s12 }
  0x19   : > { %s3155_s14 = smov [#allocation5]   ;;  %s3156_s16 = smov [#allocation10]  }
  0x1a   : > { %s3965_s29 = scalar_select %p3280_p11, 1, 0 }
  0x1b   : > { %p2832_p12 = pneg %p3280_p11  ;;  %s326_s15 = sshll.u32 %s3155_s14, 4  ;;  %s3294_s15 = int_to_ptr.vmem [resolvable:$true] %s326_s15 }
  0x1c   : > { %s3296_s22 = sshll.u32 %s3156_s16, 4  ;;  %s2966_s26 = scalar_lea.hbm %s3938_s5, 1024  ;;  %s362_s22 = int_to_ptr.vmem [resolvable:$true] %s3296_s22 }
  0x1d   : > { %p3290_p13 = pnand %p3948_p10, %p2832_p12  ;;  %p2967_p0 = scmp.ne.s32.totalorder %s3938_s5, %s2966_s26 }
  0x1e   : > { %p2973_p4 = scmp.lt.u32.totalorder %s2966_s26, %s3938_s5 }
  0x1f   : > { %p3306_p1 = pneg %p3290_p13 }
  0x21   : > { %p2969_p2 = pnand %p3306_p1, %p2967_p0 }
  0x23   : > { %p2970_p3 = pneg %p2969_p2 }
  0x25   : > { %p2975_p7 = pnand %p2973_p4, %p2970_p3 }
  0x27   : > { %2978 = shalt.err (!%p2975_p7)
}
  0x28   : > { %s2979_s19 = scalar_lea.vmem %s3286_s12, 1024  ;;  %p2987_p10 = scmp.lt.s32.totalorder %s3286_s12, %s3286_s12 }
  0x29   : > { %p2980_p8 = scmp.ne.s32.totalorder %s3286_s12, %s2979_s19  ;;  %p2988_p6 = scmp.lt.s32.totalorder %s2979_s19, %s2979_s19 }
  0x2b   : > { %p2982_p12 = pnand %p2980_p8, %p3306_p1  ;;  %p2989_p0 = por %p2988_p6, %p2987_p10 }
  0x2d   : > { %p2983_p9 = pneg %p2982_p12 }
  0x2f   : > { %p2990_p2 = pnand %p2989_p0, %p2983_p9 }
  0x31   : > { %2993 = shalt.err (!%p2990_p2)
}
  0x32   : > { %s3157_s24 = smov 128   ;;  %s3158_s26 = smov 8  }
  0x33   : > { %2838 = dma.hbm_to_vmem [thread:$0]  (!%p3290_p13), %s3938_s5, 1024, %s3286_s12, [#allocation9], %s3157_s24, %s3157_s24, %s3158_s26  }
  0x34   : > { %s3968_s2 = sld [smem:[#allocation24_spill]] }
  0x3a   : > { %s2994_s19 = scalar_lea.hbm %s3968_s2, 256 }
  0x3b   : > { %p2995_p6 = scmp.ne.s32.totalorder %s3968_s2, %s2994_s19  ;;  %p3001_p3 = scmp.lt.u32.totalorder %s2994_s19, %s3968_s2 }
  0x3d   : > { %p2997_p9 = pnand %p2995_p6, %p3306_p1 }
  0x3f   : > { %p2998_p10 = pneg %p2997_p9 }
  0x41   : > { %p3003_p4 = pnand %p3001_p3, %p2998_p10 }
  0x43   : > { %3006 = shalt.err (!%p3003_p4)
}
  0x44   : > { %s3007_s12 = scalar_lea.vmem %s3294_s15, 256  ;;  %p3015_p0 = scmp.lt.s32.totalorder %s3294_s15, %s3294_s15 }
  0x45   : > { %p3008_p7 = scmp.ne.s32.totalorder %s3294_s15, %s3007_s12  ;;  %p3016_p2 = scmp.lt.s32.totalorder %s3007_s12, %s3007_s12 }
  0x47   : > { %p3010_p8 = pnand %p3008_p7, %p3306_p1  ;;  %p3017_p6 = por %p3016_p2, %p3015_p0 }
  0x49   : > { %p3011_p12 = pneg %p3010_p8 }
  0x4b   : > { %p3018_p9 = pnand %p3017_p6, %p3011_p12 }
  0x4d   : > { %3021 = shalt.err (!%p3018_p9)
}
  0x4e   : > { %2835 = dma.hbm_to_vmem [thread:$0]  (!%p3290_p13), %s3968_s2, 256, %s3294_s15, [#allocation6], %s3157_s24, %s3157_s24, %s3158_s26  }
  0x4f   : > { %s3022_s25 = scalar_lea.hbm %s3940_s7, 1024 }
  0x50   : > { %p3023_p10 = scmp.ne.s32.totalorder %s3940_s7, %s3022_s25  ;;  %p3029_p7 = scmp.lt.u32.totalorder %s3022_s25, %s3940_s7 }
  0x52   : > { %p3025_p3 = pnand %p3023_p10, %p3306_p1 }
  0x54   : > { %p3026_p4 = pneg %p3025_p3 }
  0x56   : > { %p3031_p8 = pnand %p3029_p7, %p3026_p4 }
  0x58   : > { %3034 = shalt.err (!%p3031_p8)
}
  0x59   : > { %s3035_s12 = scalar_lea.vmem %s362_s22, 1024  ;;  %p3043_p6 = scmp.lt.s32.totalorder %s362_s22, %s362_s22 }
  0x5a   : > { %p3036_p12 = scmp.ne.s32.totalorder %s362_s22, %s3035_s12  ;;  %p3044_p9 = scmp.lt.s32.totalorder %s3035_s12, %s3035_s12 }
  0x5c   : > { %p3038_p0 = pnand %p3036_p12, %p3306_p1  ;;  %p3045_p5 = por %p3044_p9, %p3043_p6 }
  0x5e   : > { %p3039_p2 = pneg %p3038_p0 }
  0x60   : > { %p3046_p11 = pnand %p3045_p5, %p3039_p2 }
  0x62   : > { %3049 = shalt.err (!%p3046_p11)
}
  0x63   : > { %2841 = dma.hbm_to_vmem [thread:$0]  (!%p3290_p13), %s3940_s7, 1024, %s362_s22, [#allocation9], %s3157_s24, %s3157_s24, %s3158_s26  }
  0x64   : > { %p3969_p10 = scmp.ne.s32.totalorder %s3965_s29, 0 }
  0x65   : > { %p3970_p1 = scmp.eq.s32.totalorder (!%p3969_p10), %s3251_s21, 0 }
  0x66   : > { %400 = sbr.rel (%p3969_p10) target bundleno = 4026 (0xfba), region = 56 }
  0x6d   : > { %3123 = dma.done.wait (%p3970_p1), [#allocation6], 256   ;;  %p3971_p3 = pmov %p3970_p1 }
  0x6e   : > { %p3972_p5 = pmov %p3970_p1 }
  0x6f   : > { %3125 = vsyncadd (%p3971_p3), [#allocation6], 4294967040 }
  0x70   : > { %3127 = dma.done.wait (%p3972_p5), [#allocation9], 2048   ;;  %p3973_p11 = pmov %p3970_p1 }
  0x71   : > { %s3389_s23 = sand.u32 1, %s3144_s18   ;;  %s2324_s29 = sshll.u32 %s3251_s21, 2 }
  0x72   : > { %3129 = vsyncadd (%p3973_p11), [#allocation9], 4294965248  ;;  %s2322_s13 = sshll.u32 %s3389_s23, 5  ;;  %s2323_s22 = sshll.u32 %s3389_s23, 3 }
  0x73   : > { %p465_p13 = scmp.lt.s32.totalorder %s2324_s29, 7  ;;  %s470_s24 = ssub.s32 1, %s3251_s21 }
  0x74   : > { %s2326_s26 = sshll.u32 %s470_s24, 2  ;;  %s3406_s2 = scalar_lea.vmem [#allocation11], %s2322_s13 }
  0x75   : > { %s3989_s29 = smov (!%p465_p13, %s2324_s29), 7  ;;  %p472_p4 = scmp.lt.s32.totalorder %s2326_s26, 7 }
  0x76   : > { %s2325_s17 = sshll.u32 %s3989_s29, 1  ;;  %s3408_s24 = scalar_lea.vmem [#allocation12], %s2323_s22 }
  0x77   : > { %s468_s25 = scalar_lea.vmem %s3933_s0, %s2325_s17  ;;  %s3401_s16 = scalar_lea.vmem %s3942_s9, %s2325_s17 }
  0x78   : > { %s3991_s26 = smov (!%p472_p4, %s2326_s26), 7  ;;  %p3974_p7 = scmp.ne.s32.totalorder %s3251_s21, 0 }
  0x79   : > { %s2327_s19 = sshll.u32 %s3991_s26, 1  ;;  %vm490_vm0 = vcmask (!%p3974_p7), 257024   ;;  %v3159_v0 = vmov (!%p3974_p7), 0.0  }
  0x7a   : > { %s475_s11 = scalar_lea.vmem %s3934_s1, %s2327_s19  ;;  %489 = sbr.rel (%p3974_p7) target bundleno = 129 (0x81), region = 72  ;;  %491 = vst.msk [vmem:[#allocation2] sm:$0xf] (!%p3974_p7), %vm490_vm0, %v3159_v0  ;;  %492 = vst.msk [vmem:[#allocation2 + $0x4] sm:$0xf] (!%p3974_p7), %vm490_vm0, %v3159_v0 }
  0x7b   : > { %493 = vst.msk [vmem:[#allocation3] sm:$0xf] (!%p3974_p7), %vm490_vm0, %v3159_v0  ;;  %494 = vst.msk [vmem:[#allocation3 + $0x4] sm:$0xf] (!%p3974_p7), %vm490_vm0, %v3159_v0 }
  0x81 PF: > { %v495_v1 = vld [vmem:[#allocation5] sm:$0xff]  ;;  %v496_v2 = vld [vmem:[#allocation5 + $0x8] sm:$0xff]  ;;  %v515_v4 = vlaneseq  ;;  %v3160_v9 = vmov 1983009808   ;;  %v3161_v22 = vmov 0.0|0.0   ;;  %v688_v24 = vld [vmem:[%s3936_s3 + $0x10] sm:$0xff] }
  0x82   : > { %v498_v3 = vld [vmem:[%s468_s25] sm:$0x3]  ;;  %v2692_v5 = vpack.c.bf16 %v496_v2, %v495_v1  ;;  %v499_v6 = vld [vmem:[%s468_s25 + $0x2] sm:$0x3]  ;;  %v500_v7 = vld [vmem:[%s468_s25 + $0x4] sm:$0x3]  ;;  %v513_v10 = vunpack.c.l.s4 %v3160_v9  ;;  %2696 = vmatprep.subr.bf16.mxu1 %v3161_v22 }
  0x83   : > { %v501_v8 = vld [vmem:[%s468_s25 + $0x6] sm:$0x3]  ;;  %v510_v11 = vcombine.low %v498_v3, %v499_v6  ;;  %v516_v12 = vshrl.u32 %v515_v4, 7  ;;  %v502_v13 = vld [vmem:[%s475_s11] sm:$0x3]  ;;  %v687_v23 = vld [vmem:[%s3936_s3 + $0x8] sm:$0xff] }
  0x84   : > { %v503_v14 = vld [vmem:[%s475_s11 + $0x2] sm:$0x3]  ;;  %2693 = vmatprep.subr.bf16.mxu0 %v2692_v5  ;;  %v511_v15 = vcombine.low %v500_v7, %v501_v8  ;;  %v514_v16 = vunpack.c.0.s8 %v513_v10  ;;  %v504_v17 = vld [vmem:[%s475_s11 + $0x4] sm:$0x3]  ;;  %v505_v18 = vld [vmem:[%s475_s11 + $0x6] sm:$0x3] }
  0x85   : > { %v531_v19 = vcombine.low %v502_v13, %v503_v14  ;;  %v686_v20 = vld [vmem:[%s3936_s3] sm:$0xff]  ;;  %2695 = vmatpush3.bf16.msra.mxu0 %v2692_v5  ;;  %v532_v21 = vcombine.low %v504_v17, %v505_v18  ;;  %v689_v25 = vld [vmem:[%s3936_s3 + $0x18] sm:$0xff]  ;;  %vm3162_vm1 = vmmov 0   ;;  %v3163_v28 = vmov 0.0   ;;  %s3164_s19 = smov 64   ;;  %s3165_s12 = smov 32  }
  0x86   : > { %v517_v26 = vsub.s32 %v514_v16, %v516_v12  ;;  %v3426_v27 = vpack.c.bf16 %v687_v23, %v686_v20  ;;  %2504 = vmatprep.mubr.msk.f32.mxu1 %vm3162_vm1, %v3163_v28  ;;  %2702 = vmatprep.subr.bf16.mxu0 %v3161_v22  ;;  %v3431_v29 = vpack.c.bf16 %v689_v25, %v688_v24  ;;  %vm554_vm2 = vcmask 130048   ;;  %v725_v36 = vld [vmem:[#allocation2] sm:$0xf]  ;;  %v728_v3 = vld [vmem:[#allocation3] sm:$0xf]  ;;  %v690_v10 = vld [vmem:[#allocation8] sm:$0xff] }
  0x87   : > { %vm739_vm3 = vcmask 261120   ;;  %v2331_v37 = vld [vmem:[%s3937_s4] ss:$0 sm:$0xff]  ;;  %vm737_vm4 = vcmask 1041408   ;;  %v721_v62 = vand.u32 127, %v515_v4  ;;  %v693_v14 = vld [vmem:[#allocation8 + $0x18] sm:$0xff] }
  0x88   : > { %v518_v30 = vrot.slane %v510_v11, %v517_v26  ;;  %v525_v31 = vrot.slane %v511_v15, %v517_v26  ;;  %v539_v32 = vrot.slane %v531_v19, %v517_v26  ;;  %v546_v33 = vrot.slane %v532_v21, %v517_v26  ;;  %2698 = vmatpush3.bf16.msra.mxu1 %v3426_v27  ;;  %v691_v11 = vld [vmem:[#allocation8 + $0x8] sm:$0xff]  ;;  %v692_v12 = vld [vmem:[#allocation8 + $0x10] sm:$0xff]  ;;  %v694_v16 = vld [vmem:[#allocation8 + $0x20] sm:$0xff]  ;;  %s3166_s22 = smov 96   ;;  %s2391_s26 = sshll.u32 %s3251_s21, 9 }
  0x89   : > { %2699 = vmatprep.subr.bf16.mxu1 %v3161_v22  ;;  %vm722_vm5 = vcmp.ge.s32.totalorder %v721_v62, 64  ;;  %vm723_vm6 = vcmp.lt.s32.totalorder %v721_v62, 96  ;;  %v3459_v13 = vpack.c.bf16 %v691_v11, %v690_v10  ;;  %v3462_v15 = vpack.c.bf16 %v693_v14, %v692_v12  ;;  %v695_v17 = vld [vmem:[#allocation8 + $0x28] sm:$0xff]  ;;  %v696_v19 = vld [vmem:[#allocation8 + $0x30] sm:$0xff]  ;;  %v697_v20 = vld [vmem:[#allocation8 + $0x38] sm:$0xff]  ;;  %s2134_s17 = sshll.u32 %s3406_s2, 4  ;;  %s3847_s25 = scalar_lea.hbm %s3943_s10, %s2391_s26  ;;  %s3849_s17 = int_to_ptr.vmem [resolvable:$true] %s2134_s17 }
  0x8a   : > { %v526_v34 = vcombine.low %v518_v30, %v525_v31  ;;  %v547_v35 = vcombine.low %v539_v32, %v546_v33  ;;  %vm3447_vm7 = vmand %vm722_vm5, %vm723_vm6  ;;  %v3466_v18 = vpack.c.bf16 %v695_v17, %v694_v16  ;;  %v3471_v23 = vpack.c.bf16 %v697_v20, %v696_v19  ;;  %v727_v24 = vld [vmem:[#allocation2 + $0x4] sm:$0xf]  ;;  %v3492_v33 = vld [vmem:[%s3939_s6] ss:$0 sm:$0xff]  ;;  %s2111_s30 = scalar_lea.sflag [#allocation7], %s3389_s23  ;;  %s3050_s14 = scalar_lea.vmem %s3849_s17, 512 }
  0x8b   : > { %vm852_vm8 = vcmask 523264   ;;  %v708_v10 = vld [vmem:[#allocation10 + $0x18] sm:$0xff]  ;;  %v710_v14 = vld [vmem:[#allocation10 + $0x28] sm:$0xff]  ;;  %v711_v17 = vld [vmem:[#allocation10 + $0x30] sm:$0xff]  ;;  %vm2096_vm9 = vcmask 257024   ;;  %p3051_p8 = scmp.ne.s32.totalorder %s3849_s17, %s3050_s14  ;;  %p3977_p12 = scmp.ne.s32.totalorder %s3962_s27, 0 }
  0x8c   : > { %2493 = vmatprep.mubr.msk.f32.mxu0 %vm554_vm2, %v526_v34  ;;  %2701 = vmatpush3.bf16.msra.mxu1 %v3431_v29  ;;  %v712_v19 = vld [vmem:[#allocation10 + $0x38] sm:$0xff] }
  0x8d   : > { %2494 = vmatmul.mubr.msk.f32.vlgmr.msra.gmra.mrb[0].mxu0 %vm554_vm2, %v547_v35  ;;  %2714 = vmatprep.subr.bf16.mxu1 %v3161_v22  ;;  %p3052_p0 = pnand %p3051_p8, %p3977_p12 }
  0x8e   : > { %2523 = vmatprep.mubr.msk.f32.mxu0 %vm3162_vm1, %v3163_v28  ;;  %2704 = vmatpush3.bf16.msra.mxu0 %v3459_v13 }
  0x8f   : > { %2505 = vmatmul.mubr.msk.f32.vlgmr.msra.gmra.mrb[0].mxu1 %vm739_vm3, %v725_v36  ;;  %2705 = vmatprep.subr.bf16.mxu0 %v3161_v22  ;;  %p3053_p2 = pneg %p3052_p0 }
  0x90   : > { %2542 = vmatprep.mubr.msk.f32.mxu1 %vm3162_vm1, %v3163_v28 }
  0x92   : > { %2707 = vmatpush3.bf16.msra.mxu0 %v3462_v15 }
  0x93   : > { %2708 = vmatprep.subr.bf16.mxu0 %v3161_v22 }
  0x96   : > { %2710 = vmatpush3.bf16.msra.mxu0 %v3466_v18 }
  0x97   : > { %2711 = vmatprep.subr.bf16.mxu0 %v3161_v22 }
  0x9a   : > { %2713 = vmatpush3.bf16.msra.mxu0 %v3471_v23 }
  0x9b   : > { %2726 = vmatprep.subr.bf16.mxu0 %v3161_v22 }
 0x160   : > { %v2495_v38 = vpop.f32.mrb[0].mxu0 }
 0x161   : > { %v631_v39 = vadd.f32 %v2495_v38, %v2331_v37  ;;  %v625_v40 = vpop.f32.mrb[1].mxu0 }
 0x162   : > { %v626_v41 = vadd.f32 %v2331_v37, %v625_v40  ;;  %v809_v42 = vpop.f32.mrb[0].mxu1 }
 0x163   : > { %v653_v43 = vcombine.high %v631_v39, %v631_v39  ;;  %v660_v44 = vrot.slane %v631_v39, %v517_v26  ;;  %2336 = vst.sshfl [vmem:[#allocation4 + $0x8] sm:$0x3 pattern:$0x76325410] %v631_v39  ;;  %v2506_v45 = vpop.f32.mrb[1].mxu1 }
 0x164   : > { %v636_v46 = vcombine.high %v626_v41, %v626_v41  ;;  %v643_v47 = vrot.slane %v626_v41, %v517_v26  ;;  %2334 = vst.sshfl [vmem:[#allocation4] sm:$0x3 pattern:$0x76325410] %v626_v41 }
 0x165   : > { %v667_v48 = vrot.slane %v653_v43, %v517_v26  ;;  %v668_v49 = vcombine.high %v660_v44, %v660_v44  ;;  %2337 = vst.sshfl [vmem:[#allocation4 + $0xc] sm:$0x3 pattern:$0x76325410] %v653_v43 }
 0x166   : > { %v650_v50 = vrot.slane %v636_v46, %v517_v26  ;;  %v651_v51 = vcombine.high %v643_v47, %v643_v47  ;;  %2335 = vst.sshfl [vmem:[#allocation4 + $0x4] sm:$0x3 pattern:$0x76325410] %v636_v46 }
 0x167   : > { %v669_v52 = vcombine.high %v667_v48, %v667_v48  ;;  %683 = vst [vmem:[#allocation4 + $0xa] sm:$0x3] %v668_v49 }
 0x168   : > { %v652_v53 = vcombine.high %v650_v50, %v650_v50  ;;  %679 = vst [vmem:[#allocation4 + $0x2] sm:$0x3] %v651_v51 }
 0x169   : > { %685 = vst [vmem:[#allocation4 + $0xe] sm:$0x3] %v669_v52 }
 0x16a   : > { %681 = vst [vmem:[#allocation4 + $0x6] sm:$0x3] %v652_v53  ;;  %v730_v53 = vld [vmem:[#allocation3 + $0x4] sm:$0xf] }
 0x16b   : > { %v731_v56 = vld [vmem:[#allocation4] sm:$0x3] }
 0x16c   : > { %v1082_v37 = vld [vmem:[#allocation4 + $0xc] sm:$0x3] }
 0x16d   : > { %v1084_v39 = vrot.slane %v1082_v37, 6 }
 0x16f   : > { %v1080_v40 = vld [vmem:[#allocation4 + $0x2] sm:$0x3] }
 0x170   : > { %v733_v54 = vld [vmem:[#allocation4 + $0xe] sm:$0x3]  ;;  %v1086_v41 = vsel %vm737_vm4, %v1080_v40, %v1084_v39  ;;  %v3585_v39 = vld [vmem:[%s3941_s8] ss:$0 sm:$0xff] }
 0x171   : > { %v735_v55 = vrot.slane %v733_v54, 6 }
 0x173   : > { %v738_v57 = vsel %vm737_vm4, %v731_v56, %v735_v55 }
 0x174   : > { %v813_v58 = vadd.f32 %v809_v42, %v738_v57 }
 0x176   : > { %v2341_v59 = vmul.f32 -1.442695, %v813_v58 }
 0x178   : > { %2902 = vpow2.f32 %v2341_v59 }
 0x179   : > { %2904 = vtanh.f32 %v813_v58 }
 0x182   : > { %v2903_v60 = vpop.eup %2902 }
 0x183   : > { %v817_v61 = vadd.f32 1.0, %v2903_v60  ;;  %v2905_v0 = vpop.eup %2904 }
 0x185   : > { %2906 = vrcp.f32 %v817_v61 }
 0x18f   : > { %v2907_v1 = vpop.eup %2906 }
 0x190   : > { %v821_v2 = vsel %vm3447_vm7, %v2905_v0, %v2907_v1 }
 0x191   : > { %828 = vrot.lane.b32.xlu0 %v821_v2, %s3164_s19 }
 0x195   : > { %823 = vrot.lane.b32.xlu0 %v728_v3, %s3165_s12 }
 0x203   : > { %v829_v5 = vpop.permute.xlu0 %828 }
 0x204   : > { %v831_v4 = vmul.f32 %v829_v5, %v821_v2 }
 0x206   : > { %833 = vrot.lane.b32.xlu1 %v831_v4, %s3165_s12  ;;  %v705_v4 = vld [vmem:[#allocation10] sm:$0xff] }
 0x207   : > { %v824_v6 = vpop.permute.xlu0 %823 }
 0x208   : > { %v826_v7 = vmul.f32 %v824_v6, %v821_v2  ;;  %v706_v6 = vld [vmem:[#allocation10 + $0x8] sm:$0xff] }
 0x278   : > { %v834_v8 = vpop.permute.xlu1 %833 }
 0x279   : > { %v3456_v9 = vadd.f32 %v834_v8, %v826_v7  ;;  %v707_v7 = vld [vmem:[#allocation10 + $0x10] sm:$0xff]  ;;  %v3520_v8 = vpack.c.bf16 %v706_v6, %v705_v4 }
 0x27a   : > { %v3524_v12 = vpack.c.bf16 %v708_v10, %v707_v7 }
 0x27b   : > { %2908 = vtanh.f32 %v3456_v9  ;;  %2716 = vmatpush3.bf16.msra.mxu1 %v3520_v8 }
 0x27c   : > { %2717 = vmatprep.subr.bf16.mxu1 %v3161_v22 }
 0x27f   : > { %2719 = vmatpush3.bf16.msra.mxu1 %v3524_v12 }
 0x280   : > { %2720 = vmatprep.subr.bf16.mxu1 %v3161_v22 }
 0x285   : > { %v2909_v21 = vpop.eup %2908 }
 0x286   : > { %839 = vrot.lane.b32.xlu1 %v2909_v21, %s3164_s19  ;;  %v3537_v21 = vpack.c.bf16 %v712_v19, %v711_v17 }
 0x28a   : > { %848 = vrot.lane.b32.xlu1 %v727_v24, %s3165_s12 }
 0x2f8   : > { %v840_v25 = vpop.permute.xlu1 %839 }
 0x2f9   : > { %v842_v26 = vmul.f32 %v840_v25, %v821_v2 }
 0x2fb   : > { %844 = vrot.lane.b32.xlu0 %v842_v26, %s3165_s12 }
 0x2fc   : > { %v849_v30 = vpop.permute.xlu1 %848 }
 0x36d   : > { %v845_v31 = vpop.permute.xlu0 %844 }
 0x36e   : > { %v851_v32 = vsel %vm739_vm3, %v845_v31, %v849_v30 }
 0x36f   : > { %2524 = vmatmul.mubr.msk.f32.vlgmr.msra.gmra.mrb[2].mxu0 %vm852_vm8, %v851_v32 }
 0x370   : > { %2728 = vmatpush3.bf16.msra.mxu0 %v3426_v27  ;;  %2553 = vmatprep.mubr.msk.f32.mxu0 %vm3162_vm1, %v3163_v28 }
 0x371   : > { %2729 = vmatprep.subr.bf16.mxu0 %v3161_v22 }
 0x374   : > { %2731 = vmatpush3.bf16.msra.mxu0 %v3431_v29 }
 0x375   : > { %2744 = vmatprep.subr.bf16.mxu0 %v3161_v22 }
 0x377   : > { %2554 = vmatmul.mubr.msk.f32.vlgmr.msra.gmra.mrb[4].mxu0 %vm739_vm3, %v845_v31 }
 0x378   : > { %2591 = vmatprep.mubr.msk.f32.mxu0 %vm3162_vm1, %v3163_v28  ;;  %2746 = vmatpush3.bf16.msra.mxu0 %v3520_v8 }
 0x379   : > { %2747 = vmatprep.subr.bf16.mxu0 %v3161_v22 }
 0x37c   : > { %2749 = vmatpush3.bf16.msra.mxu0 %v3524_v12 }
 0x37d   : > { %2750 = vmatprep.subr.bf16.mxu0 %v3161_v22 }
 0x442   : > { %v922_v34 = vpop.f32.mrb[2].mxu0 }
 0x443   : > { %v923_v35 = vadd.f32 %v3492_v33, %v922_v34  ;;  %v2525_v36 = vpop.f32.mrb[3].mxu0 }
 0x445   : > { %v2343_v38 = vmul.f32 -1.442695, %v923_v35 }
 0x447   : > { %2910 = vpow2.f32 %v2343_v38 }
 0x44a   : > { %v1155_v42 = vpop.f32.mrb[4].mxu0 }
 0x44b   : > { %v1159_v43 = vadd.f32 %v1155_v42, %v1086_v41  ;;  %v2555_v44 = vpop.f32.mrb[5].mxu0 }
 0x44d   : > { %v2349_v45 = vmul.f32 -1.442695, %v1159_v43 }
 0x44f   : > { %2912 = vpow2.f32 %v2349_v45 }
 0x450   : > { %2914 = vtanh.f32 %v923_v35 }
 0x451   : > { %v2911_v46 = vpop.eup %2910 }
 0x452   : > { %v929_v47 = vadd.f32 1.0, %v2911_v46  ;;  %v1421_v46 = vld [vmem:[#allocation4 + $0xa] sm:$0x3] }
 0x454   : > { %2916 = vrcp.f32 %v929_v47 }
 0x455   : > { %2918 = vtanh.f32 %v1159_v43 }
 0x459   : > { %v2913_v48 = vpop.eup %2912 }
 0x45a   : > { %v1163_v49 = vadd.f32 1.0, %v2913_v48  ;;  %v2915_v50 = vpop.eup %2914  ;;  %v1423_v48 = vrot.slane %v1421_v46, 6  ;;  %v1760_v46 = vld [vmem:[#allocation4 + $0x8] sm:$0x3] }
 0x45c   : > { %2920 = vrcp.f32 %v1163_v49  ;;  %v1419_v49 = vld [vmem:[#allocation4 + $0x4] sm:$0x3] }
 0x45e   : > { %v2917_v51 = vpop.eup %2916 }
 0x45f   : > { %v3498_v52 = vsel %vm3447_vm7, %v2915_v50, %v2917_v51  ;;  %v2919_v54 = vpop.eup %2918  ;;  %v1425_v50 = vsel %vm737_vm4, %v1419_v49, %v1423_v48 }
 0x460   : > { %940 = vrot.lane.b32.xlu0 %v3498_v52, %s3164_s19 }
 0x464   : > { %935 = vrot.lane.b32.xlu0 %v730_v53, %s3165_s12 }
 0x466   : > { %v2921_v55 = vpop.eup %2920 }
 0x467   : > { %v1167_v56 = vsel %vm3447_vm7, %v2919_v54, %v2921_v55 }
 0x468   : > { %1170 = vrot.lane.b32.xlu1 %v1167_v56, %s3164_s19  ;;  %v1168_v2 = vmul.f32 %v1167_v56, %v3456_v9  ;;  %v709_v9 = vld [vmem:[#allocation10 + $0x20] sm:$0xff] }
 0x469   : > { %v3530_v16 = vpack.c.bf16 %v710_v14, %v709_v9 }
 0x46b   : > { %2722 = vmatpush3.bf16.msra.mxu1 %v3530_v16  ;;  %2752 = vmatpush3.bf16.msra.mxu0 %v3530_v16 }
 0x46c   : > { %2723 = vmatprep.subr.bf16.mxu1 %v3161_v22  ;;  %2753 = vmatprep.subr.bf16.mxu0 %v3161_v22 }
 0x46f   : > { %2725 = vmatpush3.bf16.msra.mxu1 %v3537_v21  ;;  %2755 = vmatpush3.bf16.msra.mxu0 %v3537_v21 }
 0x470   : > { %2732 = vmatprep.subr.bf16.mxu1 %v3161_v22  ;;  %2762 = vmatprep.subr.bf16.mxu0 %v3161_v22 }
 0x4d2   : > { %v3506_v57 = vpop.permute.xlu0 %940 }
 0x4d3   : > { %v943_v58 = vmul.f32 %v3506_v57, %v3498_v52 }
 0x4d5   : > { %945 = vrot.lane.b32.xlu1 %v943_v58, %s3165_s12 }
 0x4d6   : > { %v936_v61 = vpop.permute.xlu0 %935 }
 0x4d7   : > { %v938_v62 = vmul.f32 %v936_v61, %v3498_v52 }
 0x4da   : > { %v1171_v59 = vpop.permute.xlu1 %1170 }
 0x4db   : > { %v1173_v60 = vmul.f32 %v1171_v59, %v1167_v56 }
 0x4dd   : > { %1175 = vrot.lane.b32.xlu0 %v1173_v60, %s3165_s12 }
 0x547   : > { %v946_v0 = vpop.permute.xlu1 %945 }
 0x548   : > { %v3513_v1 = vadd.f32 %v946_v0, %v938_v62 }
 0x54a   : > { %2922 = vtanh.f32 %v3513_v1 }
 0x54f   : > { %v1176_v3 = vpop.permute.xlu0 %1175 }
 0x550   : > { %v3517_v5 = vadd.f32 %v1176_v3, %v1168_v2 }
 0x552   : > { %2924 = vtanh.f32 %v3517_v5 }
 0x554   : > { %v2923_v11 = vpop.eup %2922 }
 0x555   : > { %951 = vrot.lane.b32.xlu1 %v2923_v11, %s3164_s19 }
 0x55c   : > { %v2925_v20 = vpop.eup %2924 }
 0x55d   : > { %1181 = vrot.lane.b32.xlu0 %v2925_v20, %s3164_s19 }
 0x5c7   : > { %v952_v24 = vpop.permute.xlu1 %951 }
 0x5c8   : > { %v954_v25 = vmul.f32 %v952_v24, %v3498_v52 }
 0x5ca   : > { %956 = vrot.lane.b32.xlu1 %v954_v25, %s3165_s12  ;;  %v959_v26 = vrot.slane %v954_v25, 2 }
 0x5cc   : > { %960 = vrot.lane.b32.xlu0 %v959_v26, %s3164_s19 }
 0x5cf   : > { %v1182_v30 = vpop.permute.xlu0 %1181 }
 0x5d0   : > { %v1184_v31 = vmul.f32 %v1182_v30, %v1167_v56  ;;  %1189 = vrot.lane.b32.xlu0 %v954_v25, %s3164_s19 }
 0x5d2   : > { %1186 = vrot.lane.b32.xlu1 %v1184_v31, %s3165_s12 }
 0x63c   : > { %v957_v32 = vpop.permute.xlu1 %956 }
 0x63e   : > { %v961_v34 = vpop.permute.xlu0 %960 }
 0x63f   : > { %v963_v35 = vsel %vm739_vm3, %v957_v32, %v961_v34 }
 0x640   : > { %2543 = vmatmul.mubr.msk.f32.vlgmr.msra.gmra.mrb[2].mxu1 %vm852_vm8, %v963_v35 }
 0x641   : > { %2734 = vmatpush3.bf16.msra.mxu1 %v3459_v13  ;;  %2572 = vmatprep.mubr.msk.f32.mxu1 %vm3162_vm1, %v3163_v28 }
 0x642   : > { %2735 = vmatprep.subr.bf16.mxu1 %v3161_v22  ;;  %v1190_v36 = vpop.permute.xlu0 %1189 }
 0x644   : > { %v1187_v37 = vpop.permute.xlu1 %1186 }
 0x645   : > { %2737 = vmatpush3.bf16.msra.mxu1 %v3462_v15  ;;  %v1192_v38 = vsel %vm739_vm3, %v1187_v37, %v1190_v36 }
 0x646   : > { %2738 = vmatprep.subr.bf16.mxu1 %v3161_v22 }
 0x649   : > { %2740 = vmatpush3.bf16.msra.mxu1 %v3466_v18 }
 0x64a   : > { %2741 = vmatprep.subr.bf16.mxu1 %v3161_v22 }
 0x64d   : > { %2743 = vmatpush3.bf16.msra.mxu1 %v3471_v23 }
 0x64e   : > { %2756 = vmatprep.subr.bf16.mxu1 %v3161_v22 }
 0x650   : > { %2573 = vmatmul.mubr.msk.f32.vlgmr.msra.gmra.mrb[4].mxu1 %vm852_vm8, %v1192_v38 }
 0x651   : > { %2758 = vmatpush3.bf16.msra.mxu1 %v3426_v27  ;;  %2602 = vmatprep.mubr.msk.f32.mxu1 %vm3162_vm1, %v3163_v28 }
 0x652   : > { %2759 = vmatprep.subr.bf16.mxu1 %v3161_v22 }
 0x655   : > { %2761 = vmatpush3.bf16.msra.mxu1 %v3431_v29 }
 0x656   : > { %2774 = vmatprep.subr.bf16.mxu1 %v3161_v22 }
 0x658   : > { %2603 = vmatmul.mubr.msk.f32.vlgmr.msra.gmra.mrb[6].mxu1 %vm739_vm3, %v1187_v37 }
 0x659   : > { %2776 = vmatpush3.bf16.msra.mxu1 %v3520_v8  ;;  %2640 = vmatprep.mubr.msk.f32.mxu1 %vm3162_vm1, %v3163_v28 }
 0x65a   : > { %2777 = vmatprep.subr.bf16.mxu1 %v3161_v22 }
 0x65d   : > { %2779 = vmatpush3.bf16.msra.mxu1 %v3524_v12 }
 0x65e   : > { %2780 = vmatprep.subr.bf16.mxu1 %v3161_v22 }
 0x661   : > { %2782 = vmatpush3.bf16.msra.mxu1 %v3530_v16 }
 0x662   : > { %2783 = vmatprep.subr.bf16.mxu1 %v3161_v22 }
 0x665   : > { %2785 = vmatpush3.bf16.msra.mxu1 %v3537_v21 }
 0x666   : > { %2792 = vmatprep.subr.bf16.mxu1 %v3161_v22 }
 0x713   : > { %v1074_v40 = vpop.f32.mrb[2].mxu1 }
 0x714   : > { %v1075_v41 = vadd.f32 %v3585_v39, %v1074_v40  ;;  %v2544_v42 = vpop.f32.mrb[3].mxu1 }
 0x716   : > { %1078 = vst [vmem:[%s3401_s16] sm:$0x3] %v1075_v41 }
 0x723   : > { %v1262_v43 = vpop.f32.mrb[4].mxu1 }
 0x724   : > { %v1263_v44 = vadd.f32 %v3492_v33, %v1262_v43  ;;  %v2574_v45 = vpop.f32.mrb[5].mxu1 }
 0x726   : > { %v2351_v47 = vmul.f32 -1.442695, %v1263_v44 }
 0x728   : > { %2926 = vpow2.f32 %v2351_v47  ;;  %v1762_v47 = vrot.slane %v1760_v46, 6 }
 0x72b   : > { %v1494_v51 = vpop.f32.mrb[6].mxu1 }
 0x72c   : > { %v1498_v53 = vadd.f32 %v1494_v51, %v1425_v50  ;;  %v2604_v54 = vpop.f32.mrb[7].mxu1 }
 0x72e   : > { %v2360_v55 = vmul.f32 -1.442695, %v1498_v53 }
 0x730   : > { %2928 = vpow2.f32 %v2360_v55 }
 0x731   : > { %2930 = vtanh.f32 %v1263_v44 }
 0x732   : > { %v2927_v56 = vpop.eup %2926 }
 0x733   : > { %v1269_v58 = vadd.f32 1.0, %v2927_v56 }
 0x735   : > { %2932 = vrcp.f32 %v1269_v58 }
 0x736   : > { %2934 = vtanh.f32 %v1498_v53 }
 0x73a   : > { %v2929_v59 = vpop.eup %2928 }
 0x73b   : > { %v1502_v60 = vadd.f32 1.0, %v2929_v59  ;;  %v2931_v61 = vpop.eup %2930 }
 0x73d   : > { %2936 = vrcp.f32 %v1502_v60 }
 0x73f   : > { %v2933_v62 = vpop.eup %2932 }
 0x740   : > { %v3593_v0 = vsel %vm3447_vm7, %v2931_v61, %v2933_v62  ;;  %v2935_v2 = vpop.eup %2934 }
 0x741   : > { %1276 = vrot.lane.b32.xlu1 %v3593_v0, %s3164_s19  ;;  %v1274_v9 = vmul.f32 %v3593_v0, %v3513_v1 }
 0x747   : > { %v2937_v3 = vpop.eup %2936 }
 0x748   : > { %v1506_v4 = vsel %vm3447_vm7, %v2935_v2, %v2937_v3 }
 0x749   : > { %1509 = vrot.lane.b32.xlu0 %v1506_v4, %s3164_s19  ;;  %v1507_v19 = vmul.f32 %v1506_v4, %v3517_v5 }
 0x7b3   : > { %v3600_v6 = vpop.permute.xlu1 %1276 }
 0x7b4   : > { %v1279_v7 = vmul.f32 %v3600_v6, %v3593_v0 }
 0x7b6   : > { %1281 = vrot.lane.b32.xlu1 %v1279_v7, %s3165_s12 }
 0x7bb   : > { %v1510_v10 = vpop.permute.xlu0 %1509 }
 0x7bc   : > { %v1512_v11 = vmul.f32 %v1510_v10, %v1506_v4 }
 0x7be   : > { %1514 = vrot.lane.b32.xlu0 %v1512_v11, %s3165_s12 }
 0x828   : > { %v1282_v14 = vpop.permute.xlu1 %1281 }
 0x829   : > { %v3608_v17 = vadd.f32 %v1282_v14, %v1274_v9 }
 0x82b   : > { %2938 = vtanh.f32 %v3608_v17 }
 0x830   : > { %v1515_v20 = vpop.permute.xlu0 %1514 }
 0x831   : > { %v3612_v24 = vadd.f32 %v1515_v20, %v1507_v19 }
 0x833   : > { %2940 = vtanh.f32 %v3612_v24 }
 0x835   : > { %v2939_v25 = vpop.eup %2938 }
 0x836   : > { %1287 = vrot.lane.b32.xlu1 %v2939_v25, %s3164_s19 }
 0x83d   : > { %v2941_v26 = vpop.eup %2940 }
 0x83e   : > { %1520 = vrot.lane.b32.xlu0 %v2941_v26, %s3164_s19 }
 0x8a8   : > { %v1288_v30 = vpop.permute.xlu1 %1287 }
 0x8a9   : > { %v1290_v31 = vmul.f32 %v1288_v30, %v3593_v0 }
 0x8ab   : > { %1292 = vrot.lane.b32.xlu1 %v1290_v31, %s3165_s12  ;;  %v1295_v32 = vrot.slane %v1290_v31, 2 }
 0x8ad   : > { %1296 = vrot.lane.b32.xlu0 %v1295_v32, %s3164_s19 }
 0x8b0   : > { %v1521_v5 = vpop.permute.xlu0 %1520 }
 0x8b1   : > { %v1523_v34 = vmul.f32 %v1521_v5, %v1506_v4  ;;  %1528 = vrot.lane.b32.xlu0 %v1290_v31, %s3164_s19 }
 0x8b3   : > { %1525 = vrot.lane.b32.xlu1 %v1523_v34, %s3165_s12 }
 0x91d   : > { %v1293_v35 = vpop.permute.xlu1 %1292 }
 0x91f   : > { %v1297_v36 = vpop.permute.xlu0 %1296 }
 0x920   : > { %v1299_v37 = vsel %vm739_vm3, %v1293_v35, %v1297_v36 }
 0x921   : > { %2592 = vmatmul.mubr.msk.f32.vlgmr.msra.gmra.mrb[6].mxu0 %vm852_vm8, %v1299_v37 }
 0x922   : > { %2764 = vmatpush3.bf16.msra.mxu0 %v3459_v13  ;;  %2621 = vmatprep.mubr.msk.f32.mxu0 %vm3162_vm1, %v3163_v28 }
 0x923   : > { %2765 = vmatprep.subr.bf16.mxu0 %v3161_v22  ;;  %v1529_v40 = vpop.permute.xlu0 %1528 }
 0x925   : > { %v1526_v38 = vpop.permute.xlu1 %1525 }
 0x926   : > { %2767 = vmatpush3.bf16.msra.mxu0 %v3462_v15  ;;  %v1531_v41 = vsel %vm739_vm3, %v1526_v38, %v1529_v40 }
 0x927   : > { %2768 = vmatprep.subr.bf16.mxu0 %v3161_v22 }
 0x92a   : > { %2770 = vmatpush3.bf16.msra.mxu0 %v3466_v18 }
 0x92b   : > { %2771 = vmatprep.subr.bf16.mxu0 %v3161_v22 }
 0x92e   : > { %2773 = vmatpush3.bf16.msra.mxu0 %v3471_v23 }
 0x92f   : > { %2786 = vmatprep.subr.bf16.mxu0 %v3161_v22 }
 0x931   : > { %2622 = vmatmul.mubr.msk.f32.vlgmr.msra.gmra.mrb[8].mxu0 %vm852_vm8, %v1531_v41 }
 0x932   : > { %2788 = vmatpush3.bf16.msra.mxu0 %v3426_v27  ;;  %2651 = vmatprep.mubr.msk.f32.mxu0 %vm3162_vm1, %v3163_v28 }
 0x933   : > { %2789 = vmatprep.subr.bf16.mxu0 %v3161_v22 }
 0x936   : > { %2791 = vmatpush3.bf16.msra.mxu0 %v3431_v29 }
 0x937   : > { %2804 = vmatprep.subr.bf16.mxu0 %v3161_v22 }
 0x939   : > { %2652 = vmatmul.mubr.msk.f32.vlgmr.msra.gmra.mrb[10].mxu0 %vm739_vm3, %v1526_v38 }
 0x93a   : > { %2806 = vmatpush3.bf16.msra.mxu0 %v3520_v8  ;;  %2689 = vmatprep.mubr.msk.f32.mxu0 %vm3162_vm1, %v3163_v28 }
 0x93b   : > { %2807 = vmatprep.subr.bf16.mxu0 %v3161_v22 }
 0x93e   : > { %2809 = vmatpush3.bf16.msra.mxu0 %v3524_v12  ;;  %v1758_v12 = vld [vmem:[#allocation4 + $0x6] sm:$0x3] }
 0x93f   : > { %2810 = vmatprep.subr.bf16.mxu0 %v3161_v22 }
 0x942   : > { %2812 = vmatpush3.bf16.msra.mxu0 %v3530_v16  ;;  %v1764_v16 = vsel %vm737_vm4, %v1758_v12, %v1762_v47 }
 0x943   : > { %2813 = vmatprep.subr.bf16.mxu0 %v3161_v22 }
 0x946   : > { %2815 = vmatpush3.bf16.msra.mxu0 %v3537_v21 }
 0x9f4   : > { %v1412_v27 = vpop.f32.mrb[6].mxu0 }
 0x9f5   : > { %v1413_v29 = vadd.f32 %v3585_v39, %v1412_v27  ;;  %v2593_v42 = vpop.f32.mrb[7].mxu0 }
 0x9f7   : > { %2358 = vst [vmem:[%s3401_s16 + $0x2] sm:$0x3] %v1413_v29 }
 0xa04   : > { %v1601_v8 = vpop.f32.mrb[8].mxu0 }
 0xa05   : > { %v1602_v43 = vadd.f32 %v3492_v33, %v1601_v8  ;;  %v2623_v44 = vpop.f32.mrb[9].mxu0 }
 0xa07   : > { %v2362_v45 = vmul.f32 -1.442695, %v1602_v43 }
 0xa09   : > { %2942 = vpow2.f32 %v2362_v45 }
 0xa0c   : > { %v1833_v48 = vpop.f32.mrb[10].mxu0 }
 0xa0d   : > { %v1837_v49 = vadd.f32 %v1833_v48, %v1764_v16  ;;  %v2653_v50 = vpop.f32.mrb[11].mxu0 }
 0xa0e   : > { %v1310_v50 = vrot.slane %v3593_v0, 2 }
 0xa0f   : > { %v2371_v21 = vmul.f32 -1.442695, %v1837_v49 }
 0xa11   : > { %2944 = vpow2.f32 %v2371_v21 }
 0xa12   : > { %2946 = vtanh.f32 %v1602_v43 }
 0xa13   : > { %v2943_v51 = vpop.eup %2942 }
 0xa14   : > { %v1608_v53 = vadd.f32 1.0, %v2943_v51 }
 0xa16   : > { %2948 = vrcp.f32 %v1608_v53 }
 0xa17   : > { %2950 = vtanh.f32 %v1837_v49  ;;  %v973_v49 = vrot.slane %v3498_v52, 2 }
 0xa1b   : > { %v2945_v54 = vpop.eup %2944 }
 0xa1c   : > { %v1841_v55 = vadd.f32 1.0, %v2945_v54  ;;  %v2947_v56 = vpop.eup %2946 }
 0xa1e   : > { %2952 = vrcp.f32 %v1841_v55 }
 0xa20   : > { %v2949_v58 = vpop.eup %2948 }
 0xa21   : > { %v3658_v59 = vsel %vm3447_vm7, %v2947_v56, %v2949_v58  ;;  %v2951_v60 = vpop.eup %2950  ;;  %v968_v56 = vrot.slane %v3513_v1, 2 }
 0xa22   : > { %1615 = vrot.lane.b32.xlu1 %v3658_v59, %s3164_s19  ;;  %v1613_v10 = vmul.f32 %v3658_v59, %v3608_v17  ;;  %v3740_v21 = vrot.slane %v3658_v59, 2 }
 0xa28   : > { %v2953_v61 = vpop.eup %2952 }
 0xa29   : > { %v1845_v62 = vsel %vm3447_vm7, %v2951_v60, %v2953_v61 }
 0xa2a   : > { %1848 = vrot.lane.b32.xlu0 %v1845_v62, %s3164_s19  ;;  %v1846_v14 = vmul.f32 %v1845_v62, %v3612_v24 }
 0xa94   : > { %v3665_v2 = vpop.permute.xlu1 %1615 }
 0xa95   : > { %v1618_v3 = vmul.f32 %v3665_v2, %v3658_v59 }
 0xa97   : > { %1620 = vrot.lane.b32.xlu1 %v1618_v3, %s3165_s12 }
 0xa9c   : > { %v1849_v4 = vpop.permute.xlu0 %1848 }
 0xa9d   : > { %v1851_v7 = vmul.f32 %v1849_v4, %v1845_v62 }
 0xa9f   : > { %1853 = vrot.lane.b32.xlu0 %v1851_v7, %s3165_s12 }
 0xb09   : > { %v1621_v11 = vpop.permute.xlu1 %1620 }
 0xb0a   : > { %v3673_v9 = vadd.f32 %v1621_v11, %v1613_v10 }
 0xb0c   : > { %2954 = vtanh.f32 %v3673_v9 }
 0xb11   : > { %v1854_v19 = vpop.permute.xlu0 %1853 }
 0xb12   : > { %v3677_v20 = vadd.f32 %v1854_v19, %v1846_v14 }
 0xb14   : > { %2956 = vtanh.f32 %v3677_v20 }
 0xb16   : > { %v2955_v25 = vpop.eup %2954 }
 0xb17   : > { %1626 = vrot.lane.b32.xlu1 %v2955_v25, %s3164_s19 }
 0xb1e   : > { %v2957_v26 = vpop.eup %2956 }
 0xb1f   : > { %1859 = vrot.lane.b32.xlu0 %v2957_v26, %s3164_s19  ;;  %v1304_v26 = vrot.slane %v3608_v17, 2 }
 0xb89   : > { %v1627_v30 = vpop.permute.xlu1 %1626 }
 0xb8a   : > { %v1629_v31 = vmul.f32 %v1627_v30, %v3658_v59 }
 0xb8c   : > { %1631 = vrot.lane.b32.xlu1 %v1629_v31, %s3165_s12  ;;  %v1634_v32 = vrot.slane %v1629_v31, 2 }
 0xb8e   : > { %1635 = vrot.lane.b32.xlu0 %v1634_v32, %s3164_s19 }
 0xb91   : > { %v1860_v24 = vpop.permute.xlu0 %1859 }
 0xb92   : > { %v1862_v5 = vmul.f32 %v1860_v24, %v1845_v62  ;;  %1867 = vrot.lane.b32.xlu0 %v1629_v31, %s3164_s19 }
 0xb94   : > { %1864 = vrot.lane.b32.xlu1 %v1862_v5, %s3165_s12 }
 0xbfe   : > { %v1632_v34 = vpop.permute.xlu1 %1631 }
 0xc00   : > { %v1636_v35 = vpop.permute.xlu0 %1635 }
 0xc01   : > { %v1638_v36 = vsel %vm739_vm3, %v1632_v34, %v1636_v35 }
 0xc02   : > { %2641 = vmatmul.mubr.msk.f32.vlgmr.msra.gmra.mrb[8].mxu1 %vm852_vm8, %v1638_v36 }
 0xc03   : > { %2794 = vmatpush3.bf16.msra.mxu1 %v3459_v13  ;;  %2670 = vmatprep.mubr.msk.f32.mxu1 %vm3162_vm1, %v3163_v28 }
 0xc04   : > { %2795 = vmatprep.subr.bf16.mxu1 %v3161_v22  ;;  %v1868_v13 = vpop.permute.xlu0 %1867 }
 0xc06   : > { %v1865_v37 = vpop.permute.xlu1 %1864 }
 0xc07   : > { %2097 = vst.msk [vmem:[#allocation2] sm:$0xf] %vm2096_vm9, %v1865_v37  ;;  %2797 = vmatpush3.bf16.msra.mxu1 %v3462_v15  ;;  %v1870_v28 = vsel %vm739_vm3, %v1865_v37, %v1868_v13 }
 0xc08   : > { %2798 = vmatprep.subr.bf16.mxu1 %v3161_v22 }
 0xc0b   : > { %2800 = vmatpush3.bf16.msra.mxu1 %v3466_v18 }
 0xc0c   : > { %2801 = vmatprep.subr.bf16.mxu1 %v3161_v22 }
 0xc0f   : > { %2803 = vmatpush3.bf16.msra.mxu1 %v3471_v23 }
 0xc12   : > { %2671 = vmatmul.mubr.msk.f32.vlgmr.msra.gmra.mrb[10].mxu1 %vm852_vm8, %v1870_v28 }
 0xcd5   : > { %v1751_v38 = vpop.f32.mrb[8].mxu1 }
 0xcd6   : > { %v1752_v40 = vadd.f32 %v3585_v39, %v1751_v38  ;;  %v2642_v41 = vpop.f32.mrb[9].mxu1 }
 0xcd7   : > { %v1643_v41 = vrot.slane %v3673_v9, 2 }
 0xcd8   : > { %2369 = vst [vmem:[%s3401_s16 + $0x4] sm:$0x3] %v1752_v40 }
 0xce5   : > { %v1940_v27 = vpop.f32.mrb[10].mxu1 }
 0xce6   : > { %v1941_v15 = vadd.f32 %v3492_v33, %v1940_v27  ;;  %v2672_v29 = vpop.f32.mrb[11].mxu1 }
 0xce8   : > { %v2373_v42 = vmul.f32 -1.442695, %v1941_v15 }
 0xcea   : > { %2958 = vpow2.f32 %v2373_v42 }
 0xceb   : > { %2960 = vtanh.f32 %v1941_v15 }
 0xcf4   : > { %v2959_v18 = vpop.eup %2958 }
 0xcf5   : > { %v1947_v22 = vadd.f32 1.0, %v2959_v18  ;;  %v2961_v23 = vpop.eup %2960 }
 0xcf7   : > { %2962 = vrcp.f32 %v1947_v22 }
 0xd01   : > { %v2963_v8 = vpop.eup %2962 }
 0xd02   : > { %v3706_v43 = vsel %vm3447_vm7, %v2961_v23, %v2963_v8 }
 0xd03   : > { %1954 = vrot.lane.b32.xlu1 %v3706_v43, %s3164_s19  ;;  %v1952_v45 = vmul.f32 %v3706_v43, %v3673_v9  ;;  %v3752_v51 = vrot.slane %v3706_v43, 2 }
 0xd75   : > { %v3710_v44 = vpop.permute.xlu1 %1954 }
 0xd76   : > { %v1957_v33 = vmul.f32 %v3710_v44, %v3706_v43 }
 0xd78   : > { %1959 = vrot.lane.b32.xlu0 %v1957_v33, %s3165_s12 }
 0xdea   : > { %v1960_v46 = vpop.permute.xlu0 %1959 }
 0xdeb   : > { %v3717_v12 = vadd.f32 %v1960_v46, %v1952_v45 }
 0xded   : > { %2964 = vtanh.f32 %v3717_v12 }
 0xdf7   : > { %v2965_v63 = vpop.eup %2964 }
 0xdf8   : > { %1965 = vrot.lane.b32.xlu1 %v2965_v63, %s3164_s19 }
 0xe6a   : > { %v1966_v47 = vpop.permute.xlu1 %1965 }
 0xe6b   : > { %v1968_v16 = vmul.f32 %v1966_v47, %v3706_v43  ;;  %v1982_v47 = vrot.slane %v3717_v12, 2 }
 0xe6d   : > { %v1973_v48 = vrot.slane %v1968_v16, 2  ;;  %1970 = vrot.lane.b32.xlu0 %v1968_v16, %s3165_s12 }
 0xe6f   : > { %1974 = vrot.lane.b32.xlu1 %v1973_v48, %s3164_s19 }
 0xe71   : > { %965 = vrot.lane.b32.xlu0 %v3513_v1, %s3166_s22 }
 0xe73   : > { %974 = vrot.lane.b32.xlu1 %v973_v49, %s3165_s12 }
 0xe75   : > { %980 = vrot.lane.b32.xlu0 %v3498_v52, %s3166_s22 }
 0xe77   : > { %988 = vrot.lane.b32.xlu1 %v973_v49, %s3166_s22 }
 0xe79   : > { %995 = vrot.lane.b32.xlu0 %v3498_v52, %s3165_s12 }
 0xe7b   : > { %998 = vrot.lane.b32.xlu1 %v973_v49, %s3164_s19 }
 0xe7d   : > { %1301 = vrot.lane.b32.xlu0 %v3608_v17, %s3166_s22 }
 0xe7f   : > { %1311 = vrot.lane.b32.xlu1 %v1310_v50, %s3165_s12 }
 0xe81   : > { %1318 = vrot.lane.b32.xlu0 %v3593_v0, %s3166_s22 }
 0xe83   : > { %1326 = vrot.lane.b32.xlu1 %v1310_v50, %s3166_s22 }
 0xe85   : > { %1333 = vrot.lane.b32.xlu0 %v3593_v0, %s3165_s12 }
 0xe87   : > { %1336 = vrot.lane.b32.xlu1 %v1310_v50, %s3164_s19 }
 0xe89   : > { %1640 = vrot.lane.b32.xlu0 %v3673_v9, %s3166_s22 }
 0xe8b   : > { %1650 = vrot.lane.b32.xlu1 %v3740_v21, %s3165_s12 }
 0xe8d   : > { %1657 = vrot.lane.b32.xlu0 %v3658_v59, %s3166_s22 }
 0xe8f   : > { %1665 = vrot.lane.b32.xlu1 %v3740_v21, %s3166_s22 }
 0xe91   : > { %1672 = vrot.lane.b32.xlu0 %v3658_v59, %s3165_s12 }
 0xe93   : > { %1675 = vrot.lane.b32.xlu1 %v3740_v21, %s3164_s19 }
 0xe95   : > { %1979 = vrot.lane.b32.xlu0 %v3717_v12, %s3166_s22 }
 0xe97   : > { %1989 = vrot.lane.b32.xlu1 %v3752_v51, %s3165_s12 }
 0xe99   : > { %1996 = vrot.lane.b32.xlu0 %v3706_v43, %s3166_s22 }
 0xe9b   : > { %2004 = vrot.lane.b32.xlu1 %v3752_v51, %s3166_s22 }
 0xe9d   : > { %2011 = vrot.lane.b32.xlu0 %v3706_v43, %s3165_s12 }
 0xe9f   : > { %2014 = vrot.lane.b32.xlu1 %v3752_v51, %s3164_s19  ;;  %s3167_s19 = smov [#allocation11]  }
 0xea0   : > { %s3054_s15 = sshll.u32 %s3167_s19, 4  ;;  %s3055_s15 = int_to_ptr.vmem [resolvable:$false] %s3054_s15 }
 0xea1   : > { %2099 = vrot.lane.b32.xlu0 %v3677_v20, %s3166_s22  ;;  %p3057_p6 = scmp.lt.s32.totalorder %s3849_s17, %s3055_s15 }
 0xedf   : > { %v1971_v53 = vpop.permute.xlu0 %1970 }
 0xee0   : > { %2103 = vst.msk [vmem:[#allocation2 + $0x4] sm:$0xf] %vm2096_vm9, %v1971_v53 }
 0xee1   : > { %v1975_v54 = vpop.permute.xlu1 %1974 }
 0xee2   : > { %v1977_v55 = vsel %vm739_vm3, %v1971_v53, %v1975_v54 }
 0xee3   : > { %v966_v58 = vpop.permute.xlu0 %965  ;;  %2690 = vmatmul.mubr.msk.f32.vlgmr.msra.gmra.mrb[12].mxu0 %vm852_vm8, %v1977_v55 }
 0xee4   : > { %v970_v60 = vsel %vm739_vm3, %v966_v58, %v968_v56 }
 0xee5   : > { %v971_v61 = vsel %vm852_vm8, %v970_v60, 0.0  ;;  %v975_v62 = vpop.permute.xlu1 %974 }
 0xee6   : > { %972 = vst [vmem:[%s3408_s24] sm:$0x3] %v971_v61  ;;  %v977_v3 = vsel %vm739_vm3, %v3498_v52, %v975_v62 }
 0xee7   : > { %v978_v4 = vsel %vm852_vm8, %v977_v3, 0.0  ;;  %v981_v7 = vpop.permute.xlu0 %980 }
 0xee8   : > { %979 = vst [vmem:[%s3406_s2] sm:$0x3] %v978_v4  ;;  %v984_v1 = vsel %vm739_vm3, %v981_v7, %v973_v49 }
 0xee9   : > { %v985_v10 = vsel %vm852_vm8, %v984_v1, 0.0  ;;  %v989_v11 = vpop.permute.xlu1 %988 }
 0xeea   : > { %2344 = vst [vmem:[%s3406_s2 + $0x2] sm:$0x3] %v985_v10  ;;  %v991_v14 = vsel %vm739_vm3, %v3506_v57, %v989_v11 }
 0xeeb   : > { %v992_v19 = vsel %vm852_vm8, %v991_v14, 0.0  ;;  %v996_v20 = vpop.permute.xlu0 %995 }
 0xeec   : > { %2345 = vst [vmem:[%s3406_s2 + $0x4] sm:$0x3] %v992_v19 }
 0xeed   : > { %v999_v52 = vpop.permute.xlu1 %998 }
 0xeee   : > { %v1001_v25 = vsel %vm739_vm3, %v996_v20, %v999_v52 }
 0xeef   : > { %v1002_v30 = vsel %vm852_vm8, %v1001_v25, 0.0  ;;  %v1302_v31 = vpop.permute.xlu0 %1301 }
 0xef0   : > { %2346 = vst [vmem:[%s3406_s2 + $0x6] sm:$0x3] %v1002_v30  ;;  %v1306_v32 = vsel %vm739_vm3, %v1302_v31, %v1304_v26 }
 0xef1   : > { %v1307_v57 = vsel %vm852_vm8, %v1306_v32, 0.0  ;;  %v1312_v24 = vpop.permute.xlu1 %1311 }
 0xef2   : > { %2352 = vst [vmem:[%s3408_s24 + $0x2] sm:$0x3] %v1307_v57  ;;  %v1314_v5 = vsel %vm739_vm3, %v3593_v0, %v1312_v24 }
 0xef3   : > { %v1315_v34 = vsel %vm852_vm8, %v1314_v5, 0.0  ;;  %v1319_v35 = vpop.permute.xlu0 %1318 }
 0xef4   : > { %2353 = vst [vmem:[%s3406_s2 + $0x8] sm:$0x3] %v1315_v34  ;;  %v1322_v17 = vsel %vm739_vm3, %v1319_v35, %v1310_v50 }
 0xef5   : > { %v1323_v36 = vsel %vm852_vm8, %v1322_v17, 0.0  ;;  %v1327_v37 = vpop.permute.xlu1 %1326 }
 0xef6   : > { %2354 = vst [vmem:[%s3406_s2 + $0xa] sm:$0x3] %v1323_v36  ;;  %v1329_v13 = vsel %vm739_vm3, %v3600_v6, %v1327_v37 }
 0xef7   : > { %v1330_v28 = vsel %vm852_vm8, %v1329_v13, 0.0  ;;  %v1334_v38 = vpop.permute.xlu0 %1333 }
 0xef8   : > { %2355 = vst [vmem:[%s3406_s2 + $0xc] sm:$0x3] %v1330_v28 }
 0xef9   : > { %v1337_v0 = vpop.permute.xlu1 %1336 }
 0xefa   : > { %v1339_v40 = vsel %vm739_vm3, %v1334_v38, %v1337_v0 }
 0xefb   : > { %v1340_v27 = vsel %vm852_vm8, %v1339_v40, 0.0  ;;  %v1641_v15 = vpop.permute.xlu0 %1640 }
 0xefc   : > { %2356 = vst [vmem:[%s3406_s2 + $0xe] sm:$0x3] %v1340_v27  ;;  %v1645_v29 = vsel %vm739_vm3, %v1641_v15, %v1643_v41 }
 0xefd   : > { %v1646_v6 = vsel %vm852_vm8, %v1645_v29, 0.0  ;;  %v1651_v42 = vpop.permute.xlu1 %1650 }
 0xefe   : > { %2363 = vst [vmem:[%s3408_s24 + $0x4] sm:$0x3] %v1646_v6  ;;  %v1653_v18 = vsel %vm739_vm3, %v3658_v59, %v1651_v42 }
 0xeff   : > { %v1654_v22 = vsel %vm852_vm8, %v1653_v18, 0.0  ;;  %v1658_v23 = vpop.permute.xlu0 %1657 }
 0xf00   : > { %2364 = vst [vmem:[%s3406_s2 + $0x10] sm:$0x3] %v1654_v22  ;;  %v1661_v9 = vsel %vm739_vm3, %v1658_v23, %v3740_v21 }
 0xf01   : > { %v1662_v8 = vsel %vm852_vm8, %v1661_v9, 0.0  ;;  %v1666_v33 = vpop.permute.xlu1 %1665 }
 0xf02   : > { %2365 = vst [vmem:[%s3406_s2 + $0x12] sm:$0x3] %v1662_v8  ;;  %v1668_v45 = vsel %vm739_vm3, %v3665_v2, %v1666_v33 }
 0xf03   : > { %v1669_v46 = vsel %vm852_vm8, %v1668_v45, 0.0  ;;  %v1673_v63 = vpop.permute.xlu0 %1672 }
 0xf04   : > { %2366 = vst [vmem:[%s3406_s2 + $0x14] sm:$0x3] %v1669_v46 }
 0xf05   : > { %v1676_v59 = vpop.permute.xlu1 %1675 }
 0xf06   : > { %v1678_v16 = vsel %vm739_vm3, %v1673_v63, %v1676_v59 }
 0xf07   : > { %v1679_v48 = vsel %vm852_vm8, %v1678_v16, 0.0  ;;  %v1980_v49 = vpop.permute.xlu0 %1979 }
 0xf08   : > { %2367 = vst [vmem:[%s3406_s2 + $0x16] sm:$0x3] %v1679_v48  ;;  %v1984_v50 = vsel %vm739_vm3, %v1980_v49, %v1982_v47  ;;  %2104 = vst.msk [vmem:[#allocation3 + $0x4] sm:$0xf] %vm2096_vm9, %v1980_v49 }
 0xf09   : > { %v1985_v2 = vsel %vm852_vm8, %v1984_v50, 0.0  ;;  %v1990_v21 = vpop.permute.xlu1 %1989 }
 0xf0a   : > { %2374 = vst [vmem:[%s3408_s24 + $0x6] sm:$0x3] %v1985_v2  ;;  %v1992_v53 = vsel %vm739_vm3, %v3706_v43, %v1990_v21 }
 0xf0b   : > { %v1993_v12 = vsel %vm852_vm8, %v1992_v53, 0.0  ;;  %v1997_v54 = vpop.permute.xlu0 %1996 }
 0xf0c   : > { %2375 = vst [vmem:[%s3406_s2 + $0x18] sm:$0x3] %v1993_v12  ;;  %v2000_v55 = vsel %vm739_vm3, %v1997_v54, %v3752_v51 }
 0xf0d   : > { %v2001_v56 = vsel %vm852_vm8, %v2000_v55, 0.0  ;;  %v2005_v58 = vpop.permute.xlu1 %2004 }
 0xf0e   : > { %2376 = vst [vmem:[%s3406_s2 + $0x1a] sm:$0x3] %v2001_v56  ;;  %v2007_v60 = vsel %vm739_vm3, %v3710_v44, %v2005_v58 }
 0xf0f   : > { %v2008_v43 = vsel %vm852_vm8, %v2007_v60, 0.0  ;;  %v2012_v61 = vpop.permute.xlu0 %2011 }
 0xf10   : > { %2377 = vst [vmem:[%s3406_s2 + $0x1c] sm:$0x3] %v2008_v43 }
 0xf11   : > { %v2015_v62 = vpop.permute.xlu1 %2014 }
 0xf12   : > { %v2017_v3 = vsel %vm739_vm3, %v2012_v61, %v2015_v62 }
 0xf13   : > { %v2018_v4 = vsel %vm852_vm8, %v2017_v3, 0.0  ;;  %v2100_v7 = vpop.permute.xlu0 %2099 }
 0xf14   : > { %2378 = vst [vmem:[%s3406_s2 + $0x1e] sm:$0x3] %v2018_v4  ;;  %2102 = vst.msk [vmem:[#allocation3] sm:$0xf] %vm2096_vm9, %v2100_v7  ;;  %s3056_s2 = scalar_lea.vmem %s3055_s15, 1024 }
 0xf15   : > { %p3058_p9 = scmp.lt.s32.totalorder %s3056_s2, %s3050_s14 }
 0xf17   : > { %p3059_p10 = por %p3058_p9, %p3057_p6 }
 0xf19   : > { %p3060_p1 = pnand %p3059_p10, %p3053_p2 }
 0xf1b   : > { %3063 = shalt.err (!%p3060_p1)
}
 0xf1c   : > { %s3064_s11 = scalar_lea.hbm %s3847_s25, 512  ;;  %s3068_s22 = scalar_lea.hbm %s3943_s10, 1024 }
 0xf1d   : > { %p3065_p3 = scmp.ne.s32.totalorder %s3847_s25, %s3064_s11  ;;  %p3069_p13 = scmp.lt.u32.totalorder %s3847_s25, %s3943_s10 }
 0xf1e   : > { %p3070_p4 = scmp.lt.u32.totalorder %s3068_s22, %s3064_s11  ;;  %p3072_p8 = scmp.lt.u32.totalorder %s3064_s11, %s3847_s25 }
 0xf1f   : > { %p3066_p5 = pnand %p3065_p3, %p3977_p12 }
 0xf20   : > { %p3071_p7 = por %p3070_p4, %p3069_p13 }
 0xf21   : > { %p3067_p11 = pneg %p3066_p5 }
 0xf22   : > { %p3073_p0 = por %p3072_p8, %p3071_p7 }
 0xf24   : > { %p3074_p2 = pnand %p3073_p0, %p3067_p11 }
 0xf26   : > { %3077 = shalt.err (!%p3074_p2)
}
 0xf27   : > { %s3168_s28 = smov 2   ;;  %s2392_s14 = sshll.u32 %s3251_s21, 7 }
 0xf28   : > { %2828 = dma.vmem_to_hbm [thread:$0]  (%p3977_p12), %s3849_s17, 512, %s3847_s25, %s2111_s30, %s3165_s12, %s3165_s12, %s3168_s28  }
 0xf29   : > { %s3978_s2 = sld [smem:[#allocation25_spill]]  ;;  %s2150_s29 = sshll.u32 %s3408_s24, 4  ;;  %s3885_s29 = int_to_ptr.vmem [resolvable:$true] %s2150_s29 }
 0xf2a   : > { %s2116_s13 = scalar_lea.sflag [#allocation13], %s3389_s23  ;;  %s3078_s22 = scalar_lea.vmem %s3885_s29, 128 }
 0xf2b   : > { %p3079_p6 = scmp.ne.s32.totalorder %s3885_s29, %s3078_s22  ;;  %s3169_s26 = smov [#allocation12]  }
 0xf2c   : > { %s3082_s17 = sshll.u32 %s3169_s26, 4  ;;  %s3083_s17 = int_to_ptr.vmem [resolvable:$false] %s3082_s17 }
 0xf2d   : > { %p3080_p9 = pnand %p3079_p6, %p3977_p12  ;;  %s3084_s21 = scalar_lea.vmem %s3083_s17, 256 }
 0xf2e   : > { %p3085_p1 = scmp.lt.s32.totalorder %s3885_s29, %s3083_s17  ;;  %p3086_p3 = scmp.lt.s32.totalorder %s3084_s21, %s3078_s22 }
 0xf2f   : > { %s3882_s11 = scalar_lea.hbm %s3978_s2, %s2392_s14  ;;  %p3081_p10 = pneg %p3080_p9 }
 0xf30   : > { %p3087_p5 = por %p3086_p3, %p3085_p1 }
 0xf32   : > { %p3088_p11 = pnand %p3087_p5, %p3081_p10 }
 0xf34   : > { %3091 = shalt.err (!%p3088_p11)
}
 0xf35   : > { %s3092_s24 = scalar_lea.hbm %s3882_s11, 128  ;;  %s3096_s20 = scalar_lea.hbm %s3978_s2, 256 }
 0xf36   : > { %p3093_p13 = scmp.ne.s32.totalorder %s3882_s11, %s3092_s24  ;;  %p3097_p8 = scmp.lt.u32.totalorder %s3882_s11, %s3978_s2 }
 0xf37   : > { %p3098_p0 = scmp.lt.u32.totalorder %s3096_s20, %s3092_s24  ;;  %p3100_p6 = scmp.lt.u32.totalorder %s3092_s24, %s3882_s11 }
 0xf38   : > { %p3094_p4 = pnand %p3093_p13, %p3977_p12 }
 0xf39   : > { %p3099_p2 = por %p3098_p0, %p3097_p8 }
 0xf3a   : > { %p3095_p7 = pneg %p3094_p4 }
 0xf3b   : > { %p3101_p9 = por %p3100_p6, %p3099_p2 }
 0xf3d   : > { %p3102_p10 = pnand %p3101_p9, %p3095_p7 }
 0xf3f   : > { %3105 = shalt.err (!%p3102_p10)
}
 0xf40   : > { %2829 = dma.vmem_to_hbm [thread:$0]  (%p3977_p12), %s3885_s29, 128, %s3882_s11, %s2116_s13, %s3165_s12, %s3165_s12, %s3168_s28  }
 0xfb6   : > { %v2090_v44 = vpop.f32.mrb[12].mxu0 }
 0xfb7   : > { %v2091_v51 = vadd.f32 %v3585_v39, %v2090_v44  ;;  %v2691_v1 = vpop.f32.mrb[13].mxu0 }
 0xfb9   : > { %2380 = vst [vmem:[%s3401_s16 + $0x6] sm:$0x3] %v2091_v51 }
 0xfba PF: > { %s3979_s15 = sld [smem:[#allocation20_spill]]  ;;  %s3980_s22 = sld [smem:[#allocation18_spill]] }
 0xfbb   : > { %s3981_s26 = sld [smem:[#allocation23_spill]] }
 0xfc0   : > { %p2855_p1 = scmp.ge.s32.totalorder %s3979_s15, 2  ;;  %s2173_s27 = sand.u32 1, %s3980_s22  }
 0xfc1   : > { %p3982_p3 = scmp.ne.s32.totalorder %s3981_s26, 0  ;;  %s2174_s17 = scalar_lea.sflag [#allocation7], %s2173_s27 }
 0xfc3   : > { %p2843_p5 = pnand %p2855_p1, %p3982_p3 }
 0xfc5   : > { %3131 = dma.done.wait (!%p2843_p5), %s2174_s17, 512  }
 0xfc6   : > { %3133 = vsyncadd (!%p2843_p5), %s2174_s17, 4294966784  ;;  %s2183_s23 = scalar_lea.sflag [#allocation13], %s2173_s27 }
 0xfc7   : > { %3135 = dma.done.wait (!%p2843_p5), %s2183_s23, 128  }
 0xfc8   : > { %3137 = vsyncadd (!%p2843_p5), %s2183_s23, 4294967168  ;;  %s3983_s20 = sld [smem:[#allocation21_spill]]  ;;  %s3984_s12 = sld [smem:[#allocation19_spill]] }
 0xfc9   : > { %s3985_s19 = sld [smem:[#allocation22_spill]]  ;;  %s3986_s17 = smov %s3144_s18 }
 0xfce   : > { %p27_p12 = scmp.ge.s32.totalorder %s3983_s20, 4   ;;  %s3987_s18 = smov %s3984_s12 }
 0xfd0   :  { %29 = sbr.rel (!%p27_p12) target bundleno = 10 (0xa), region = 170 }
 0xfd7   :  { %2188 = vsyncpa [#allocation6], 1 }
 0xfd8   :  { %2190 = vsyncpa [#allocation6 + $0x1], 1 }
 0xfd9   :  { %2191 = vsyncpa [#allocation9], 1 }
 0xfda   :  { %2192 = vsyncpa [#allocation7], 1 }
 0xfdb   :  { %2194 = vsyncpa [#allocation7 + $0x1], 1 }
 0xfdc   :  { %2195 = vsyncpa [#allocation13], 1 }
 0xfdd   :  { %2197 = vsyncpa [#allocation13 + $0x1], 1 }

</bundles_post_ra>
